<compile_context>
chip_gen: v7x
topology: tpu7x:2x2x1
jax: 0.10.0
libtpu: 0.0.40
codegen_flags: <defaults>
</compile_context>

<pallas_src>
import math

import jax
import jax.numpy as jnp
from jax import lax
from jax.experimental import pallas as pl
from jax.experimental.pallas import tpu as pltpu

# ---- small, lane-aligned, module-consistent config ------------------------
D_MODEL = 128                 # module default is 512; 128 keeps the demo small AND lane-dense
NHEAD = 4
HEAD_DIM = D_MODEL // NHEAD   # 32
DIM_FF = 256
NUM_LAYERS = 4                # matches module default num_encoder_layers
LN_EPS = 1e-5
NEG_INF = -1e30


def _layer_norm(x, w, b):
    mean = jnp.mean(x, axis=-1, keepdims=True)
    var = jnp.mean((x - mean) ** 2, axis=-1, keepdims=True)
    return (x - mean) * lax.rsqrt(var + LN_EPS) * w + b


def transformer_kernel(src_ref, pos_ref, mask_ref,
                       wqk_ref, wv_ref, wo_ref, w1_ref, w2_ref,
                       bqk_ref, b1_ref, vec_ref,
                       out_ref, x_ref):
    """One (batch element, layer) step. Activation lives in x_ref (VMEM scratch)."""
    layer = pl.program_id(1)

    @pl.when(layer == 0)
    def _():
        x_ref[...] = src_ref[...]

    x = x_ref[...]                  # (L, D) f32, resident across the layer axis
    pos = pos_ref[...]              # (L, D)
    mask = mask_ref[0]              # (1, L) additive key-padding bias

    wqk = wqk_ref[0]                # (D, 2D) bf16, q-scale folded in
    wv = wv_ref[0]                  # (D, D)  bf16
    wo = wo_ref[0]                  # (D, D)  bf16
    w1 = w1_ref[0]                  # (D, FF) bf16
    w2 = w2_ref[0]                  # (FF, D) bf16
    bqk = bqk_ref[0]                # (1, 2D) f32
    b1 = b1_ref[0]                  # (1, FF) f32
    vecs = vec_ref[0]               # (8, D)  f32 packed vectors
    bv, bo, b2 = vecs[0:1], vecs[1:2], vecs[2:3]
    ln1w, ln1b = vecs[3:4], vecs[4:5]
    ln2w, ln2b = vecs[5:6], vecs[6:7]

    # --- self attention: q = k = src + pos, value = src ---------------------
    qk_in = (x + pos).astype(jnp.bfloat16)                                  # (L, D)
    qk = jnp.dot(qk_in, wqk, preferred_element_type=jnp.float32) + bqk      # (L, 2D)
    v = jnp.dot(x.astype(jnp.bfloat16), wv,
                preferred_element_type=jnp.float32) + bv                    # (L, D)

    # per-head scores / softmax / context (tiny (L, L) tiles; heads are static
    # 32-lane slices of the lane-dense projection output)
    ctx_heads = []
    for h in range(NHEAD):
        lo = h * HEAD_DIM
        qh = qk[:, lo:lo + HEAD_DIM]                                        # (L, Hd)
        kh = qk[:, D_MODEL + lo:D_MODEL + lo + HEAD_DIM]                    # (L, Hd)
        vh = v[:, lo:lo + HEAD_DIM]                                         # (L, Hd)
        s = lax.dot_general(qh, kh, (((1,), (1,)), ((), ())),
                            preferred_element_type=jnp.float32)             # (L, L)
        s = s + mask
        s = s - jnp.max(s, axis=-1, keepdims=True)
        e = jnp.exp(s)
        p = e * pl.reciprocal(jnp.sum(e, axis=-1, keepdims=True), approx=True)
        ctx_heads.append(jnp.dot(p, vh, preferred_element_type=jnp.float32))

    ctx = jnp.concatenate(ctx_heads, axis=1)                                # (L, D) head-concat in lanes
    attn = jnp.dot(ctx.astype(jnp.bfloat16), wo,
                   preferred_element_type=jnp.float32) + bo                 # (L, D)

    # dropout / droppath are identity in eval mode
    x1 = _layer_norm(x + attn, ln1w, ln1b)

    # --- feed-forward --------------------------------------------------------
    hdn = jnp.dot(x1.astype(jnp.bfloat16), w1, preferred_element_type=jnp.float32) + b1
    hdn = jax.nn.gelu(hdn, approximate=True)   # tanh GELU (EUP slot)
    # TODO(synk): PyTorch F.gelu default is exact-erf; tanh approximation used here.
    ffn = jnp.dot(hdn.astype(jnp.bfloat16), w2, preferred_element_type=jnp.float32) + b2

    x_new = _layer_norm(x1 + ffn, ln2w, ln2b)
    x_ref[...] = x_new

    @pl.when(layer == pl.num_programs(1) - 1)
    def _():
        out_ref[...] = x_new.astype(out_ref.dtype)


def transformer_forward(src, mask, pos_embed, packed):
    """src: (B, L, D) f32; mask: (B, L) bool (True = padded key); pos_embed: (B, L, D)."""
    B, L, D = src.shape
    assert D == D_MODEL
    N = B * L
    mask_bias = jnp.where(mask, NEG_INF, 0.0).astype(jnp.float32).reshape(B, 1, L)
    src2 = src.reshape(N, D).astype(jnp.float32)
    pos2 = pos_embed.reshape(N, D).astype(jnp.float32)

    wqk, wv, wo, w1, w2, bqk, b1, vec = packed

    def per_batch(shape):
        nd = len(shape)
        return pl.BlockSpec(shape, lambda b, l, _nd=nd: (b,) + (0,) * (_nd - 1))

    def per_layer(arr):
        shape = (1,) + arr.shape[1:]
        nd = arr.ndim
        return pl.BlockSpec(shape, lambda b, l, _nd=nd: (l,) + (0,) * (_nd - 1))

    in_specs = [
        per_batch((L, D)),            # src  (rows b*L .. b*L+L)
        per_batch((L, D)),            # pos
        per_batch((1, 1, L)),         # key-padding bias
        per_layer(wqk), per_layer(wv), per_layer(wo),
        per_layer(w1), per_layer(w2),
        per_layer(bqk), per_layer(b1), per_layer(vec),
    ]

    out2 = pl.pallas_call(
        transformer_kernel,
        out_shape=jax.ShapeDtypeStruct((N, D), jnp.float32),
        grid_spec=pltpu.PrefetchScalarGridSpec(
            num_scalar_prefetch=0,
            grid=(B, NUM_LAYERS),                 # batch (parallel) x layers (pipelined)
            in_specs=in_specs,
            out_specs=pl.BlockSpec((L, D), lambda b, l: (b, 0)),
            scratch_shapes=[pltpu.VMEM((L, D), jnp.float32)],   # persistent activation
        ),
        compiler_params=pltpu.CompilerParams(
            dimension_semantics=("parallel", "arbitrary"),
            vmem_limit_bytes=32 * 1024 * 1024,
        ),
    )(src2, pos2, mask_bias, wqk, wv, wo, w1, w2, bqk, b1, vec)
    return out2.reshape(B, L, D)


# ---- deterministic synthetic parameters (xavier-uniform weights) ----------
def xavier_uniform(key, shape):
    fan_in, fan_out = shape
    limit = math.sqrt(6.0 / (fan_in + fan_out))
    return jax.random.uniform(key, shape, jnp.float32, -limit, limit)


def make_layer_params(key):
    ks = jax.random.split(key, 8)
    return dict(
        wq=xavier_uniform(ks[0], (D_MODEL, D_MODEL)),   # math convention: x @ W
        wk=xavier_uniform(ks[1], (D_MODEL, D_MODEL)),
        wv=xavier_uniform(ks[2], (D_MODEL, D_MODEL)),
        wo=xavier_uniform(ks[3], (D_MODEL, D_MODEL)),
        w1=xavier_uniform(ks[4], (D_MODEL, DIM_FF)),
        w2=xavier_uniform(ks[5], (DIM_FF, D_MODEL)),
        bq=jnp.zeros((D_MODEL,), jnp.float32),
        bk=jnp.zeros((D_MODEL,), jnp.float32),
        bv=jnp.zeros((D_MODEL,), jnp.float32),
        bo=jnp.zeros((D_MODEL,), jnp.float32),
        b1=0.01 * jax.random.normal(ks[6], (DIM_FF,), jnp.float32),
        b2=0.01 * jax.random.normal(ks[7], (D_MODEL,), jnp.float32),
        ln1w=jnp.ones((D_MODEL,), jnp.float32),
        ln1b=jnp.zeros((D_MODEL,), jnp.float32),
        ln2w=jnp.ones((D_MODEL,), jnp.float32),
        ln2b=jnp.zeros((D_MODEL,), jnp.float32),
    )


def pack_params(layer_params):
    """Stack per-layer params into the lane-dense, scale-folded, bf16 layout the
    fused kernel consumes (done once, outside the kernel, in plain JAX)."""
    scale = 1.0 / math.sqrt(HEAD_DIM)
    wqk_l, wv_l, wo_l, w1_l, w2_l, bqk_l, b1_l, vec_l = ([] for _ in range(8))
    for p in layer_params:
        wqk_l.append(jnp.concatenate([p['wq'] * scale, p['wk']], axis=1))       # (D, 2D)
        bqk_l.append(jnp.concatenate([p['bq'] * scale, p['bk']]).reshape(1, 2 * D_MODEL))
        wv_l.append(p['wv'])                                                    # (D, D)
        wo_l.append(p['wo'])                                                    # (D, D) head-concat rows
        w1_l.append(p['w1'])
        w2_l.append(p['w2'])
        b1_l.append(p['b1'].reshape(1, DIM_FF))
        vec_l.append(jnp.stack([p['bv'], p['bo'], p['b2'],
                                p['ln1w'], p['ln1b'], p['ln2w'], p['ln2b'],
                                jnp.zeros((D_MODEL,), jnp.float32)], axis=0))   # (8, D)

    def stack(lst, dtype=jnp.float32):
        return jnp.stack(lst, axis=0).astype(dtype)

    return (stack(wqk_l, jnp.bfloat16), stack(wv_l, jnp.bfloat16), stack(wo_l, jnp.bfloat16),
            stack(w1_l, jnp.bfloat16), stack(w2_l, jnp.bfloat16),
            stack(bqk_l), stack(b1_l), stack(vec_l))


if __name__ == "__main__":
    B, L = 2, 8
    root = jax.random.PRNGKey(0)
    k_src, k_pos, k_params = jax.random.split(root, 3)

    src = jax.random.normal(k_src, (B, L, D_MODEL), jnp.float32)
    pos_embed = jax.random.normal(k_pos, (B, L, D_MODEL), jnp.float32)
    lengths = jnp.array([L, L - 2])                       # second sample: 2 padded tokens
    mask = jnp.arange(L)[None, :] >= lengths[:, None]     # True = pad (key_padding_mask)

    layer_params = [make_layer_params(jax.random.fold_in(k_params, i))
                    for i in range(NUM_LAYERS)]
    packed = pack_params(layer_params)

    out = transformer_forward(src, mask, pos_embed, packed)
    out = jax.block_until_ready(out)
    assert out.shape == (B, L, D_MODEL)
    assert bool(jnp.all(jnp.isfinite(out)))
    print("KERNEL_OK")
</pallas_src>

<mosaic_0001>
module attributes {stable_mosaic.version = 11 : i64} {
  func.func @transformer_kernel(%arg0: i32, %arg1: i32, %arg2: memref<8x128xf32, #tpu.memory_space<vmem>>, %arg3: memref<8x128xf32, #tpu.memory_space<vmem>>, %arg4: memref<1x1x8xf32, #tpu.memory_space<vmem>>, %arg5: memref<1x128x256xbf16, #tpu.memory_space<vmem>>, %arg6: memref<1x128x128xbf16, #tpu.memory_space<vmem>>, %arg7: memref<1x128x128xbf16, #tpu.memory_space<vmem>>, %arg8: memref<1x128x256xbf16, #tpu.memory_space<vmem>>, %arg9: memref<1x256x128xbf16, #tpu.memory_space<vmem>>, %arg10: memref<1x1x256xf32, #tpu.memory_space<vmem>>, %arg11: memref<1x1x256xf32, #tpu.memory_space<vmem>>, %arg12: memref<1x8x128xf32, #tpu.memory_space<vmem>>, %arg13: memref<8x128xf32, #tpu.memory_space<vmem>>, %arg14: memref<8x128xf32, #tpu.memory_space<vmem>>) attributes {dimension_semantics = [#tpu.dimension_semantics<parallel>, #tpu.dimension_semantics<arbitrary>], iteration_bounds = array<i64: 2, 4>, scalar_prefetch = 0 : i64, scratch_operands = 1 : i64, tpu.core_type = #tpu.core_type<tc>, window_params = [{transform_indices = @transform_0, window_bounds = array<i64: 8, 128>}, {transform_indices = @transform_1, window_bounds = array<i64: 8, 128>}, {transform_indices = @transform_2, window_bounds = array<i64: 1, 1, 8>}, {transform_indices = @transform_3, window_bounds = array<i64: 1, 128, 256>}, {transform_indices = @transform_4, window_bounds = array<i64: 1, 128, 128>}, {transform_indices = @transform_5, window_bounds = array<i64: 1, 128, 128>}, {transform_indices = @transform_6, window_bounds = array<i64: 1, 128, 256>}, {transform_indices = @transform_7, window_bounds = array<i64: 1, 256, 128>}, {transform_indices = @transform_8, window_bounds = array<i64: 1, 1, 256>}, {transform_indices = @transform_9, window_bounds = array<i64: 1, 1, 256>}, {transform_indices = @transform_10, window_bounds = array<i64: 1, 8, 128>}, {transform_indices = @transform_11, window_bounds = array<i64: 8, 128>}]} {
    %c0_i32 = arith.constant 0 : i32
    %0 = arith.cmpi eq, %arg1, %c0_i32 : i32
    %1 = arith.extui %0 : i1 to i32
    %c0_i32_0 = arith.constant 0 : i32
    %2 = arith.cmpi ne, %1, %c0_i32_0 : i32
    scf.if %2 {
      %c0_68 = arith.constant 0 : index
      %c0_69 = arith.constant 0 : index
      %183 = vector.load %arg2[%c0_68, %c0_69] : memref<8x128xf32, #tpu.memory_space<vmem>>, vector<8x128xf32>
      %c0_70 = arith.constant 0 : index
      %c0_71 = arith.constant 0 : index
      %184 = vector.load %arg14[%c0_70, %c0_71] : memref<8x128xf32, #tpu.memory_space<vmem>>, vector<8x128xf32>
      tpu.vector_store %arg14[%c0_70, %c0_71], %183 {strides = array<i32>} : memref<8x128xf32, #tpu.memory_space<vmem>>, vector<8x128xf32>,
    } else {
    }
    %c0 = arith.constant 0 : index
    %c0_1 = arith.constant 0 : index
    %3 = vector.load %arg14[%c0, %c0_1] : memref<8x128xf32, #tpu.memory_space<vmem>>, vector<8x128xf32>
    %c0_2 = arith.constant 0 : index
    %c0_3 = arith.constant 0 : index
    %4 = vector.load %arg3[%c0_2, %c0_3] : memref<8x128xf32, #tpu.memory_space<vmem>>, vector<8x128xf32>
    %c0_4 = arith.constant 0 : index
    %c0_5 = arith.constant 0 : index
    %c0_6 = arith.constant 0 : index
    %5 = vector.load %arg4[%c0_4, %c0_5, %c0_6] : memref<1x1x8xf32, #tpu.memory_space<vmem>>, vector<1x1x8xf32>
    %6 = vector.shape_cast %5 : vector<1x1x8xf32> to vector<1x8xf32>
    %c0_7 = arith.constant 0 : index
    %c0_8 = arith.constant 0 : index
    %c0_9 = arith.constant 0 : index
    %7 = vector.load %arg5[%c0_7, %c0_8, %c0_9] : memref<1x128x256xbf16, #tpu.memory_space<vmem>>, vector<1x128x256xbf16>
    %8 = vector.shape_cast %7 : vector<1x128x256xbf16> to vector<128x256xbf16>
    %c0_10 = arith.constant 0 : index
    %c0_11 = arith.constant 0 : index
    %c0_12 = arith.constant 0 : index
    %9 = vector.load %arg6[%c0_10, %c0_11, %c0_12] : memref<1x128x128xbf16, #tpu.memory_space<vmem>>, vector<1x128x128xbf16>
    %10 = vector.shape_cast %9 : vector<1x128x128xbf16> to vector<128x128xbf16>
    %c0_13 = arith.constant 0 : index
    %c0_14 = arith.constant 0 : index
    %c0_15 = arith.constant 0 : index
    %11 = vector.load %arg7[%c0_13, %c0_14, %c0_15] : memref<1x128x128xbf16, #tpu.memory_space<vmem>>, vector<1x128x128xbf16>
    %12 = vector.shape_cast %11 : vector<1x128x128xbf16> to vector<128x128xbf16>
    %c0_16 = arith.constant 0 : index
    %c0_17 = arith.constant 0 : index
    %c0_18 = arith.constant 0 : index
    %13 = vector.load %arg8[%c0_16, %c0_17, %c0_18] : memref<1x128x256xbf16, #tpu.memory_space<vmem>>, vector<1x128x256xbf16>
    %14 = vector.shape_cast %13 : vector<1x128x256xbf16> to vector<128x256xbf16>
    %c0_19 = arith.constant 0 : index
    %c0_20 = arith.constant 0 : index
    %c0_21 = arith.constant 0 : index
    %15 = vector.load %arg9[%c0_19, %c0_20, %c0_21] : memref<1x256x128xbf16, #tpu.memory_space<vmem>>, vector<1x256x128xbf16>
    %16 = vector.shape_cast %15 : vector<1x256x128xbf16> to vector<256x128xbf16>
    %c0_22 = arith.constant 0 : index
    %c0_23 = arith.constant 0 : index
    %c0_24 = arith.constant 0 : index
    %17 = vector.load %arg10[%c0_22, %c0_23, %c0_24] : memref<1x1x256xf32, #tpu.memory_space<vmem>>, vector<1x1x256xf32>
    %18 = vector.shape_cast %17 : vector<1x1x256xf32> to vector<1x256xf32>
    %c0_25 = arith.constant 0 : index
    %c0_26 = arith.constant 0 : index
    %c0_27 = arith.constant 0 : index
    %19 = vector.load %arg11[%c0_25, %c0_26, %c0_27] : memref<1x1x256xf32, #tpu.memory_space<vmem>>, vector<1x1x256xf32>
    %20 = vector.shape_cast %19 : vector<1x1x256xf32> to vector<1x256xf32>
    %c0_28 = arith.constant 0 : index
    %c0_29 = arith.constant 0 : index
    %c0_30 = arith.constant 0 : index
    %21 = vector.load %arg12[%c0_28, %c0_29, %c0_30] : memref<1x8x128xf32, #tpu.memory_space<vmem>>, vector<1x8x128xf32>
    %22 = vector.shape_cast %21 : vector<1x8x128xf32> to vector<8x128xf32>
    %23 = vector.extract_strided_slice %22 {offsets = [0, 0], sizes = [1, 128], strides = [1, 1]} : vector<8x128xf32> to vector<1x128xf32>
    %24 = vector.extract_strided_slice %22 {offsets = [1, 0], sizes = [1, 128], strides = [1, 1]} : vector<8x128xf32> to vector<1x128xf32>
    %25 = vector.extract_strided_slice %22 {offsets = [2, 0], sizes = [1, 128], strides = [1, 1]} : vector<8x128xf32> to vector<1x128xf32>
    %26 = vector.extract_strided_slice %22 {offsets = [3, 0], sizes = [1, 128], strides = [1, 1]} : vector<8x128xf32> to vector<1x128xf32>
    %27 = vector.extract_strided_slice %22 {offsets = [4, 0], sizes = [1, 128], strides = [1, 1]} : vector<8x128xf32> to vector<1x128xf32>
    %28 = vector.extract_strided_slice %22 {offsets = [5, 0], sizes = [1, 128], strides = [1, 1]} : vector<8x128xf32> to vector<1x128xf32>
    %29 = vector.extract_strided_slice %22 {offsets = [6, 0], sizes = [1, 128], strides = [1, 1]} : vector<8x128xf32> to vector<1x128xf32>
    %30 = arith.addf %3, %4 : vector<8x128xf32>
    %31 = arith.truncf %30 : vector<8x128xf32> to vector<8x128xbf16>
    %cst = arith.constant dense<0.000000e+00> : vector<8x256xf32>
    %32 = tpu.matmul %31, %8, %cst {dimension_numbers = #tpu.dot_dimension_numbers<[1], [0], [0], [1], [0, 0, 1, 1], [], []>} : vector<8x128xbf16>, vector<128x256xbf16>, vector<8x256xf32> -> vector<8x256xf32>
    %33 = vector.broadcast %18 : vector<1x256xf32> to vector<8x256xf32>
    %34 = arith.addf %32, %33 : vector<8x256xf32>
    %35 = arith.truncf %3 : vector<8x128xf32> to vector<8x128xbf16>
    %cst_31 = arith.constant dense<0.000000e+00> : vector<8x128xf32>
    %36 = tpu.matmul %35, %10, %cst_31 {dimension_numbers = #tpu.dot_dimension_numbers<[1], [0], [0], [1], [0, 0, 1, 1], [], []>} : vector<8x128xbf16>, vector<128x128xbf16>, vector<8x128xf32> -> vector<8x128xf32>
    %37 = vector.broadcast %23 : vector<1x128xf32> to vector<8x128xf32>
    %38 = arith.addf %36, %37 : vector<8x128xf32>
    %39 = vector.extract_strided_slice %34 {offsets = [0, 0], sizes = [8, 32], strides = [1, 1]} : vector<8x256xf32> to vector<8x32xf32>
    %40 = vector.extract_strided_slice %34 {offsets = [0, 128], sizes = [8, 32], strides = [1, 1]} : vector<8x256xf32> to vector<8x32xf32>
    %41 = vector.extract_strided_slice %38 {offsets = [0, 0], sizes = [8, 32], strides = [1, 1]} : vector<8x128xf32> to vector<8x32xf32>
    %cst_32 = arith.constant dense<0.000000e+00> : vector<8x8xf32>
    %42 = tpu.matmul %39, %40, %cst_32 {dimension_numbers = #tpu.dot_dimension_numbers<[1], [1], [0], [0], [0, 0, 1, 0], [], []>} : vector<8x32xf32>, vector<8x32xf32>, vector<8x8xf32> -> vector<8x8xf32>
    %43 = vector.broadcast %6 : vector<1x8xf32> to vector<8x8xf32>
    %44 = arith.addf %42, %43 : vector<8x8xf32>
    %cst_33 = arith.constant dense<0xFF800000> : vector<8xf32>
    %45 = vector.multi_reduction <maximumf>, %44, %cst_33 [1] : vector<8x8xf32> to vector<8xf32>
    %46 = vector.shape_cast %45 : vector<8xf32> to vector<8x1xf32>
    %47 = vector.broadcast %46 : vector<8x1xf32> to vector<8x8xf32>
    %48 = arith.subf %44, %47 : vector<8x8xf32>
    %49 = math.exp %48 : vector<8x8xf32>
    %cst_34 = arith.constant dense<0.000000e+00> : vector<8xf32>
    %50 = vector.multi_reduction <add>, %49, %cst_34 [1] : vector<8x8xf32> to vector<8xf32>
    %51 = vector.shape_cast %50 : vector<8xf32> to vector<8x1xf32>
    %52 = tpu.reciprocal %51 {approx = true} : vector<8x1xf32> -> vector<8x1xf32>
    %53 = vector.broadcast %52 : vector<8x1xf32> to vector<8x8xf32>
    %54 = arith.mulf %49, %53 : vector<8x8xf32>
    %cst_35 = arith.constant dense<0.000000e+00> : vector<8x32xf32>
    %55 = tpu.matmul %54, %41, %cst_35 {dimension_numbers = #tpu.dot_dimension_numbers<[1], [0], [0], [1], [0, 0, 1, 1], [], []>} : vector<8x8xf32>, vector<8x32xf32>, vector<8x32xf32> -> vector<8x32xf32>
    %56 = vector.extract_strided_slice %34 {offsets = [0, 32], sizes = [8, 32], strides = [1, 1]} : vector<8x256xf32> to vector<8x32xf32>
    %57 = vector.extract_strided_slice %34 {offsets = [0, 160], sizes = [8, 32], strides = [1, 1]} : vector<8x256xf32> to vector<8x32xf32>
    %58 = vector.extract_strided_slice %38 {offsets = [0, 32], sizes = [8, 32], strides = [1, 1]} : vector<8x128xf32> to vector<8x32xf32>
    %cst_36 = arith.constant dense<0.000000e+00> : vector<8x8xf32>
    %59 = tpu.matmul %56, %57, %cst_36 {dimension_numbers = #tpu.dot_dimension_numbers<[1], [1], [0], [0], [0, 0, 1, 0], [], []>} : vector<8x32xf32>, vector<8x32xf32>, vector<8x8xf32> -> vector<8x8xf32>
    %60 = vector.broadcast %6 : vector<1x8xf32> to vector<8x8xf32>
    %61 = arith.addf %59, %60 : vector<8x8xf32>
    %cst_37 = arith.constant dense<0xFF800000> : vector<8xf32>
    %62 = vector.multi_reduction <maximumf>, %61, %cst_37 [1] : vector<8x8xf32> to vector<8xf32>
    %63 = vector.shape_cast %62 : vector<8xf32> to vector<8x1xf32>
    %64 = vector.broadcast %63 : vector<8x1xf32> to vector<8x8xf32>
    %65 = arith.subf %61, %64 : vector<8x8xf32>
    %66 = math.exp %65 : vector<8x8xf32>
    %cst_38 = arith.constant dense<0.000000e+00> : vector<8xf32>
    %67 = vector.multi_reduction <add>, %66, %cst_38 [1] : vector<8x8xf32> to vector<8xf32>
    %68 = vector.shape_cast %67 : vector<8xf32> to vector<8x1xf32>
    %69 = tpu.reciprocal %68 {approx = true} : vector<8x1xf32> -> vector<8x1xf32>
    %70 = vector.broadcast %69 : vector<8x1xf32> to vector<8x8xf32>
    %71 = arith.mulf %66, %70 : vector<8x8xf32>
    %cst_39 = arith.constant dense<0.000000e+00> : vector<8x32xf32>
    %72 = tpu.matmul %71, %58, %cst_39 {dimension_numbers = #tpu.dot_dimension_numbers<[1], [0], [0], [1], [0, 0, 1, 1], [], []>} : vector<8x8xf32>, vector<8x32xf32>, vector<8x32xf32> -> vector<8x32xf32>
    %73 = vector.extract_strided_slice %34 {offsets = [0, 64], sizes = [8, 32], strides = [1, 1]} : vector<8x256xf32> to vector<8x32xf32>
    %74 = vector.extract_strided_slice %34 {offsets = [0, 192], sizes = [8, 32], strides = [1, 1]} : vector<8x256xf32> to vector<8x32xf32>
    %75 = vector.extract_strided_slice %38 {offsets = [0, 64], sizes = [8, 32], strides = [1, 1]} : vector<8x128xf32> to vector<8x32xf32>
    %cst_40 = arith.constant dense<0.000000e+00> : vector<8x8xf32>
    %76 = tpu.matmul %73, %74, %cst_40 {dimension_numbers = #tpu.dot_dimension_numbers<[1], [1], [0], [0], [0, 0, 1, 0], [], []>} : vector<8x32xf32>, vector<8x32xf32>, vector<8x8xf32> -> vector<8x8xf32>
    %77 = vector.broadcast %6 : vector<1x8xf32> to vector<8x8xf32>
    %78 = arith.addf %76, %77 : vector<8x8xf32>
    %cst_41 = arith.constant dense<0xFF800000> : vector<8xf32>
    %79 = vector.multi_reduction <maximumf>, %78, %cst_41 [1] : vector<8x8xf32> to vector<8xf32>
    %80 = vector.shape_cast %79 : vector<8xf32> to vector<8x1xf32>
    %81 = vector.broadcast %80 : vector<8x1xf32> to vector<8x8xf32>
    %82 = arith.subf %78, %81 : vector<8x8xf32>
    %83 = math.exp %82 : vector<8x8xf32>
    %cst_42 = arith.constant dense<0.000000e+00> : vector<8xf32>
    %84 = vector.multi_reduction <add>, %83, %cst_42 [1] : vector<8x8xf32> to vector<8xf32>
    %85 = vector.shape_cast %84 : vector<8xf32> to vector<8x1xf32>
    %86 = tpu.reciprocal %85 {approx = true} : vector<8x1xf32> -> vector<8x1xf32>
    %87 = vector.broadcast %86 : vector<8x1xf32> to vector<8x8xf32>
    %88 = arith.mulf %83, %87 : vector<8x8xf32>
    %cst_43 = arith.constant dense<0.000000e+00> : vector<8x32xf32>
    %89 = tpu.matmul %88, %75, %cst_43 {dimension_numbers = #tpu.dot_dimension_numbers<[1], [0], [0], [1], [0, 0, 1, 1], [], []>} : vector<8x8xf32>, vector<8x32xf32>, vector<8x32xf32> -> vector<8x32xf32>
    %90 = vector.extract_strided_slice %34 {offsets = [0, 96], sizes = [8, 32], strides = [1, 1]} : vector<8x256xf32> to vector<8x32xf32>
    %91 = vector.extract_strided_slice %34 {offsets = [0, 224], sizes = [8, 32], strides = [1, 1]} : vector<8x256xf32> to vector<8x32xf32>
    %92 = vector.extract_strided_slice %38 {offsets = [0, 96], sizes = [8, 32], strides = [1, 1]} : vector<8x128xf32> to vector<8x32xf32>
    %cst_44 = arith.constant dense<0.000000e+00> : vector<8x8xf32>
    %93 = tpu.matmul %90, %91, %cst_44 {dimension_numbers = #tpu.dot_dimension_numbers<[1], [1], [0], [0], [0, 0, 1, 0], [], []>} : vector<8x32xf32>, vector<8x32xf32>, vector<8x8xf32> -> vector<8x8xf32>
    %94 = vector.broadcast %6 : vector<1x8xf32> to vector<8x8xf32>
    %95 = arith.addf %93, %94 : vector<8x8xf32>
    %cst_45 = arith.constant dense<0xFF800000> : vector<8xf32>
    %96 = vector.multi_reduction <maximumf>, %95, %cst_45 [1] : vector<8x8xf32> to vector<8xf32>
    %97 = vector.shape_cast %96 : vector<8xf32> to vector<8x1xf32>
    %98 = vector.broadcast %97 : vector<8x1xf32> to vector<8x8xf32>
    %99 = arith.subf %95, %98 : vector<8x8xf32>
    %100 = math.exp %99 : vector<8x8xf32>
    %cst_46 = arith.constant dense<0.000000e+00> : vector<8xf32>
    %101 = vector.multi_reduction <add>, %100, %cst_46 [1] : vector<8x8xf32> to vector<8xf32>
    %102 = vector.shape_cast %101 : vector<8xf32> to vector<8x1xf32>
    %103 = tpu.reciprocal %102 {approx = true} : vector<8x1xf32> -> vector<8x1xf32>
    %104 = vector.broadcast %103 : vector<8x1xf32> to vector<8x8xf32>
    %105 = arith.mulf %100, %104 : vector<8x8xf32>
    %cst_47 = arith.constant dense<0.000000e+00> : vector<8x32xf32>
    %106 = tpu.matmul %105, %92, %cst_47 {dimension_numbers = #tpu.dot_dimension_numbers<[1], [0], [0], [1], [0, 0, 1, 1], [], []>} : vector<8x8xf32>, vector<8x32xf32>, vector<8x32xf32> -> vector<8x32xf32>
    %107 = tpu.concatenate %55, %72, %89, %106 in 1 : vector<8x32xf32>, vector<8x32xf32>, vector<8x32xf32>, vector<8x32xf32> -> vector<8x128xf32>
    %108 = arith.truncf %107 : vector<8x128xf32> to vector<8x128xbf16>
    %cst_48 = arith.constant dense<0.000000e+00> : vector<8x128xf32>
    %109 = tpu.matmul %108, %12, %cst_48 {dimension_numbers = #tpu.dot_dimension_numbers<[1], [0], [0], [1], [0, 0, 1, 1], [], []>} : vector<8x128xbf16>, vector<128x128xbf16>, vector<8x128xf32> -> vector<8x128xf32>
    %110 = vector.broadcast %24 : vector<1x128xf32> to vector<8x128xf32>
    %111 = arith.addf %109, %110 : vector<8x128xf32>
    %112 = arith.addf %3, %111 : vector<8x128xf32>
    %cst_49 = arith.constant dense<0.000000e+00> : vector<8xf32>
    %113 = vector.multi_reduction <add>, %112, %cst_49 [1] : vector<8x128xf32> to vector<8xf32>
    %114 = vector.shape_cast %113 : vector<8xf32> to vector<8x1xf32>
    %cst_50 = arith.constant 1.280000e+02 : f32
    %115 = vector.broadcast %cst_50 : f32 to vector<8x1xf32>
    %116 = arith.divf %114, %115 : vector<8x1xf32>
    %117 = vector.broadcast %116 : vector<8x1xf32> to vector<8x128xf32>
    %118 = arith.subf %112, %117 : vector<8x128xf32>
    %119 = arith.mulf %118, %118 : vector<8x128xf32>
    %cst_51 = arith.constant dense<0.000000e+00> : vector<8xf32>
    %120 = vector.multi_reduction <add>, %119, %cst_51 [1] : vector<8x128xf32> to vector<8xf32>
    %121 = vector.shape_cast %120 : vector<8xf32> to vector<8x1xf32>
    %cst_52 = arith.constant 1.280000e+02 : f32
    %122 = vector.broadcast %cst_52 : f32 to vector<8x1xf32>
    %123 = arith.divf %121, %122 : vector<8x1xf32>
    %124 = vector.broadcast %116 : vector<8x1xf32> to vector<8x128xf32>
    %125 = arith.subf %112, %124 : vector<8x128xf32>
    %cst_53 = arith.constant 9.99999974E-6 : f32
    %126 = vector.broadcast %cst_53 : f32 to vector<8x1xf32>
    %127 = arith.addf %123, %126 : vector<8x1xf32>
    %128 = math.rsqrt %127 : vector<8x1xf32>
    %129 = vector.broadcast %128 : vector<8x1xf32> to vector<8x128xf32>
    %130 = arith.mulf %125, %129 : vector<8x128xf32>
    %131 = vector.broadcast %26 : vector<1x128xf32> to vector<8x128xf32>
    %132 = arith.mulf %130, %131 : vector<8x128xf32>
    %133 = vector.broadcast %27 : vector<1x128xf32> to vector<8x128xf32>
    %134 = arith.addf %132, %133 : vector<8x128xf32>
    %135 = arith.truncf %134 : vector<8x128xf32> to vector<8x128xbf16>
    %cst_54 = arith.constant dense<0.000000e+00> : vector<8x256xf32>
    %136 = tpu.matmul %135, %14, %cst_54 {dimension_numbers = #tpu.dot_dimension_numbers<[1], [0], [0], [1], [0, 0, 1, 1], [], []>} : vector<8x128xbf16>, vector<128x256xbf16>, vector<8x256xf32> -> vector<8x256xf32>
    %137 = vector.broadcast %20 : vector<1x256xf32> to vector<8x256xf32>
    %138 = arith.addf %136, %137 : vector<8x256xf32>
    %139 = arith.mulf %138, %138 : vector<8x256xf32>
    %140 = arith.mulf %138, %139 : vector<8x256xf32>
    %cst_55 = arith.constant 4.471500e-02 : f32
    %141 = vector.broadcast %cst_55 : f32 to vector<8x256xf32>
    %142 = arith.mulf %141, %140 : vector<8x256xf32>
    %143 = arith.addf %138, %142 : vector<8x256xf32>
    %cst_56 = arith.constant 0.797884583 : f32
    %144 = vector.broadcast %cst_56 : f32 to vector<8x256xf32>
    %145 = arith.mulf %144, %143 : vector<8x256xf32>
    %146 = math.tanh %145 : vector<8x256xf32>
    %cst_57 = arith.constant 1.000000e+00 : f32
    %147 = vector.broadcast %cst_57 : f32 to vector<8x256xf32>
    %148 = arith.addf %147, %146 : vector<8x256xf32>
    %cst_58 = arith.constant 5.000000e-01 : f32
    %149 = vector.broadcast %cst_58 : f32 to vector<8x256xf32>
    %150 = arith.mulf %149, %148 : vector<8x256xf32>
    %151 = arith.mulf %138, %150 : vector<8x256xf32>
    %152 = arith.truncf %151 : vector<8x256xf32> to vector<8x256xbf16>
    %cst_59 = arith.constant dense<0.000000e+00> : vector<8x128xf32>
    %153 = tpu.matmul %152, %16, %cst_59 {dimension_numbers = #tpu.dot_dimension_numbers<[1], [0], [0], [1], [0, 0, 1, 1], [], []>} : vector<8x256xbf16>, vector<256x128xbf16>, vector<8x128xf32> -> vector<8x128xf32>
    %154 = vector.broadcast %25 : vector<1x128xf32> to vector<8x128xf32>
    %155 = arith.addf %153, %154 : vector<8x128xf32>
    %156 = arith.addf %134, %155 : vector<8x128xf32>
    %cst_60 = arith.constant dense<0.000000e+00> : vector<8xf32>
    %157 = vector.multi_reduction <add>, %156, %cst_60 [1] : vector<8x128xf32> to vector<8xf32>
    %158 = vector.shape_cast %157 : vector<8xf32> to vector<8x1xf32>
    %cst_61 = arith.constant 1.280000e+02 : f32
    %159 = vector.broadcast %cst_61 : f32 to vector<8x1xf32>
    %160 = arith.divf %158, %159 : vector<8x1xf32>
    %161 = vector.broadcast %160 : vector<8x1xf32> to vector<8x128xf32>
    %162 = arith.subf %156, %161 : vector<8x128xf32>
    %163 = arith.mulf %162, %162 : vector<8x128xf32>
    %cst_62 = arith.constant dense<0.000000e+00> : vector<8xf32>
    %164 = vector.multi_reduction <add>, %163, %cst_62 [1] : vector<8x128xf32> to vector<8xf32>
    %165 = vector.shape_cast %164 : vector<8xf32> to vector<8x1xf32>
    %cst_63 = arith.constant 1.280000e+02 : f32
    %166 = vector.broadcast %cst_63 : f32 to vector<8x1xf32>
    %167 = arith.divf %165, %166 : vector<8x1xf32>
    %168 = vector.broadcast %160 : vector<8x1xf32> to vector<8x128xf32>
    %169 = arith.subf %156, %168 : vector<8x128xf32>
    %cst_64 = arith.constant 9.99999974E-6 : f32
    %170 = vector.broadcast %cst_64 : f32 to vector<8x1xf32>
    %171 = arith.addf %167, %170 : vector<8x1xf32>
    %172 = math.rsqrt %171 : vector<8x1xf32>
    %173 = vector.broadcast %172 : vector<8x1xf32> to vector<8x128xf32>
    %174 = arith.mulf %169, %173 : vector<8x128xf32>
    %175 = vector.broadcast %28 : vector<1x128xf32> to vector<8x128xf32>
    %176 = arith.mulf %174, %175 : vector<8x128xf32>
    %177 = vector.broadcast %29 : vector<1x128xf32> to vector<8x128xf32>
    %178 = arith.addf %176, %177 : vector<8x128xf32>
    %c0_65 = arith.constant 0 : index
    %c0_66 = arith.constant 0 : index
    %179 = vector.load %arg14[%c0_65, %c0_66] : memref<8x128xf32, #tpu.memory_space<vmem>>, vector<8x128xf32>
    tpu.vector_store %arg14[%c0_65, %c0_66], %178 {strides = array<i32>} : memref<8x128xf32, #tpu.memory_space<vmem>>, vector<8x128xf32>,
    %c3_i32 = arith.constant 3 : i32
    %180 = arith.cmpi eq, %arg1, %c3_i32 : i32
    %181 = arith.extui %180 : i1 to i32
    %c0_i32_67 = arith.constant 0 : i32
    %182 = arith.cmpi ne, %181, %c0_i32_67 : i32
    scf.if %182 {
      %c0_68 = arith.constant 0 : index
      %c0_69 = arith.constant 0 : index
      %183 = vector.load %arg13[%c0_68, %c0_69] : memref<8x128xf32, #tpu.memory_space<vmem>>, vector<8x128xf32>
      tpu.vector_store %arg13[%c0_68, %c0_69], %178 {strides = array<i32>} : memref<8x128xf32, #tpu.memory_space<vmem>>, vector<8x128xf32>,
    } else {
    }
    return
  }
  func.func @transform_0(%arg0: i32, %arg1: i32) -> (i32, i32) {
    %c0_i32 = arith.constant 0 : i32
    %c0_i32_0 = arith.constant 0 : i32
    return %arg0, %c0_i32 : i32, i32
  }
  func.func @transform_1(%arg0: i32, %arg1: i32) -> (i32, i32) {
    %c0_i32 = arith.constant 0 : i32
    %c0_i32_0 = arith.constant 0 : i32
    return %arg0, %c0_i32 : i32, i32
  }
  func.func @transform_2(%arg0: i32, %arg1: i32) -> (i32, i32, i32) {
    %c0_i32 = arith.constant 0 : i32
    %c0_i32_0 = arith.constant 0 : i32
    %c0_i32_1 = arith.constant 0 : i32
    return %arg0, %c0_i32, %c0_i32_0 : i32, i32, i32
  }
  func.func @transform_3(%arg0: i32, %arg1: i32) -> (i32, i32, i32) {
    %c0_i32 = arith.constant 0 : i32
    %c0_i32_0 = arith.constant 0 : i32
    %c0_i32_1 = arith.constant 0 : i32
    return %arg1, %c0_i32, %c0_i32_0 : i32, i32, i32
  }
  func.func @transform_4(%arg0: i32, %arg1: i32) -> (i32, i32, i32) {
    %c0_i32 = arith.constant 0 : i32
    %c0_i32_0 = arith.constant 0 : i32
    %c0_i32_1 = arith.constant 0 : i32
    return %arg1, %c0_i32, %c0_i32_0 : i32, i32, i32
  }
  func.func @transform_5(%arg0: i32, %arg1: i32) -> (i32, i32, i32) {
    %c0_i32 = arith.constant 0 : i32
    %c0_i32_0 = arith.constant 0 : i32
    %c0_i32_1 = arith.constant 0 : i32
    return %arg1, %c0_i32, %c0_i32_0 : i32, i32, i32
  }
  func.func @transform_6(%arg0: i32, %arg1: i32) -> (i32, i32, i32) {
    %c0_i32 = arith.constant 0 : i32
    %c0_i32_0 = arith.constant 0 : i32
    %c0_i32_1 = arith.constant 0 : i32
    return %arg1, %c0_i32, %c0_i32_0 : i32, i32, i32
  }
  func.func @transform_7(%arg0: i32, %arg1: i32) -> (i32, i32, i32) {
    %c0_i32 = arith.constant 0 : i32
    %c0_i32_0 = arith.constant 0 : i32
    %c0_i32_1 = arith.constant 0 : i32
    return %arg1, %c0_i32, %c0_i32_0 : i32, i32, i32
  }
  func.func @transform_8(%arg0: i32, %arg1: i32) -> (i32, i32, i32) {
    %c0_i32 = arith.constant 0 : i32
    %c0_i32_0 = arith.constant 0 : i32
    %c0_i32_1 = arith.constant 0 : i32
    return %arg1, %c0_i32, %c0_i32_0 : i32, i32, i32
  }
  func.func @transform_9(%arg0: i32, %arg1: i32) -> (i32, i32, i32) {
    %c0_i32 = arith.constant 0 : i32
    %c0_i32_0 = arith.constant 0 : i32
    %c0_i32_1 = arith.constant 0 : i32
    return %arg1, %c0_i32, %c0_i32_0 : i32, i32, i32
  }
  func.func @transform_10(%arg0: i32, %arg1: i32) -> (i32, i32, i32) {
    %c0_i32 = arith.constant 0 : i32
    %c0_i32_0 = arith.constant 0 : i32
    %c0_i32_1 = arith.constant 0 : i32
    return %arg1, %c0_i32, %c0_i32_0 : i32, i32, i32
  }
  func.func @transform_11(%arg0: i32, %arg1: i32) -> (i32, i32) {
    %c0_i32 = arith.constant 0 : i32
    %c0_i32_0 = arith.constant 0 : i32
    return %arg0, %c0_i32 : i32, i32
  }
}

</mosaic_0001>

<bundles_post_ra>
// kernel: tpu_custom_call.1
= control target key start
LH: loop header
LB: loop body
LE: loop exit
PB: predicated region body
PF: predicated region fallthrough
CT: control target
= control target key end

     0   :  { %s4352_s0 = inlined_call_operand.hbm [shape: f32[16,128], index: 0, kind: input, shape index: {}]   ;;  %s4353_s1 = inlined_call_operand.hbm [shape: f32[16,128], index: 1, kind: input, shape index: {}]   ;;  %s4354_s2 = inlined_call_operand.vmem [shape: f32[2,1,8], index: 2, kind: input, shape index: {}]   ;;  %s4355_s3 = inlined_call_operand.hbm [shape: bf16[4,128,256], index: 3, kind: input, shape index: {}]   ;;  %s4356_s4 = inlined_call_operand.hbm [shape: bf16[4,128,128], index: 4, kind: input, shape index: {}]   ;;  %s4357_s5 = inlined_call_operand.hbm [shape: bf16[4,128,128], index: 5, kind: input, shape index: {}]   ;;  %s4358_s6 = inlined_call_operand.hbm [shape: bf16[4,128,256], index: 6, kind: input, shape index: {}]   ;;  %s4359_s7 = inlined_call_operand.hbm [shape: bf16[4,256,128], index: 7, kind: input, shape index: {}]   ;;  %s4360_s8 = inlined_call_operand.hbm [shape: f32[4,1,256], index: 8, kind: input, shape index: {}]   ;;  %s4361_s9 = inlined_call_operand.hbm [shape: f32[4,1,256], index: 9, kind: input, shape index: {}]   ;;  %s4362_s10 = inlined_call_operand.vmem [shape: f32[4,8,128], index: 10, kind: input, shape index: {}]   ;;  %s4363_s11 = inlined_call_operand.hbm [shape: f32[16,128], index: 11, kind: output, shape index: {}]  }
   0x1   :  { %4412 = sst [smem:[#allocation44_spill]] %s4352_s0 }
   0x2   :  { %4413 = sst [smem:[#allocation45_spill]] %s4353_s1 }
   0x3   :  { %4414 = sst [smem:[#allocation46_spill]] %s4354_s2 }
   0x4   :  { %4415 = sst [smem:[#allocation47_spill]] %s4356_s4 }
   0x5   :  { %4416 = sst [smem:[#allocation48_spill]] %s4358_s6 }
   0x6   :  { %4417 = sst [smem:[#allocation49_spill]] %s4359_s7 }
   0x7   :  { %4418 = sst [smem:[#allocation50_spill]] %s4362_s10 }
   0x8   :  { %4419 = sst [smem:[#allocation51_spill]] %s4363_s11 }
   0x9   :  { %16 = vsyncpa [#allocation4], 0 }
   0xa   :  { %18 = vsyncpa [#allocation4 + $0x1], 0 }
   0xb   :  { %19 = vsyncpa [#allocation7], 0 }
   0xc   :  { %21 = vsyncpa [#allocation7 + $0x1], 0 }
   0xd   :  { %22 = vsyncpa [#allocation10], 0 }
   0xe   :  { %24 = vsyncpa [#allocation10 + $0x1], 0 }
   0xf   :  { %25 = vsyncpa [#allocation13], 0 }
  0x10   :  { %27 = vsyncpa [#allocation13 + $0x1], 0 }
  0x11   :  { %28 = vsyncpa [#allocation16], 0 }
  0x12   :  { %30 = vsyncpa [#allocation16 + $0x1], 0 }
  0x13   :  { %31 = vsyncpa [#allocation5], 0 }
  0x14   :  { %33 = vsyncpa [#allocation5 + $0x1], 0  ;;  %s3505_s17 = smov 0   ;;  %s3507_s18 = smov 0  }
  0x15   :  { %s3509_s19 = smov 0   ;;  %s3511_s20 = smov 0  }
  0x16   :  { %s3513_s21 = smov 0   ;;  %s3515_s22 = smov 0  }
  0x17   :  { %s3517_s23 = smov 0   ;;  %s3519_s24 = smov 0  }
  0x18   :  { %s3521_s25 = smov 0   ;;  %s3523_s26 = smov 0  }
  0x19   :  { %s3525_s27 = smov 0  }
  0x1a LB: > { %4420 = sst [smem:[#allocation26_spill]] %s3387_s18  ;;  %s3561_s28 = sadd.s32 4294967295, %s3423_s27   ;;  %s3423_s27 = sphi %s3525_s27, %s39_s27   ;;  %s3419_s26 = sphi %s3523_s26, %s4512_s26   ;;  %s3415_s25 = sphi %s3521_s25, %s4511_s25   ;;  %s3411_s24 = sphi %s3519_s24, %s4510_s24   ;;  %s3407_s23 = sphi %s3517_s23, %s4509_s23   ;;  %s3403_s22 = sphi %s3515_s22, %s4508_s22   ;;  %s3399_s21 = sphi %s3513_s21, %s4507_s21   ;;  %s3395_s20 = sphi %s3511_s20, %s4503_s20   ;;  %s3391_s19 = sphi %s3509_s19, %s4502_s19   ;;  %s3387_s18 = sphi %s3507_s18, %s4501_s18   ;;  %s3383_s17 = sphi %s3505_s17, %s4500_s17  }
  0x1b   : > { %4421 = sst [smem:[#allocation27_spill]] %s3391_s19  ;;  %s2489_s29 = sadd.s32 4294967294, %s3423_s27  }
  0x1c   : > { %4422 = sst [smem:[#allocation28_spill]] %s3395_s20  ;;  %s48_s30 = sadd.s32 1, %s3415_s25 }
  0x1d   : > { %4423 = sst [smem:[#allocation29_spill]] %s3399_s21  ;;  %s51_s12 = sadd.s32 1, %s3419_s26 }
  0x1e   : > { %4424 = sst [smem:[#allocation30_spill]] %s3407_s23  ;;  %p49_p0 = scmp.ge.s32.totalorder %s48_s30, 4 }
  0x1f   : > { %4425 = sst [smem:[#allocation31_spill]] %s3411_s24  ;;  %s58_s13 = sadd.s32 1, %s3403_s22 }
  0x20   : > { %4426 = sst [smem:[#allocation32_spill]] %s3423_s27  ;;  %p65_p1 = scmp.ne.s32.totalorder %s3403_s22, %s3399_s21 }
  0x21   : > { %4427 = sst [smem:[#allocation33_spill]] %s3561_s28  ;;  %p66_p2 = scmp.eq.s32.totalorder %s3423_s27, 0 }
  0x22   : > { %s4514_s30 = smov (%p49_p0, %s48_s30), 0  ;;  %s4516_s12 = smov (!%p49_p0, %s51_s12), %s3419_s26 }
  0x23   : > { %4428 = sst [smem:[#allocation34_spill]] %s4514_s30  ;;  %p3578_p3 = por %p66_p2, %p65_p1 }
  0x24   : > { %p4367_p4 = scmp.ne.s32.totalorder %s3399_s21, %s3395_s20  ;;  %p53_p5 = scmp.ge.s32.totalorder %s4516_s12, 2 }
  0x25   : > { %p72_p6 = scmp.eq.s32.totalorder %s3561_s28, 0  ;;  %s133_s15 = ssub.s32 %s3415_s25, %s4514_s30 }
  0x26   : > { %s136_s16 = sadd.s32 1, %s3391_s19  ;;  %s4518_s12 = smov (%p53_p5, %s4516_s12), 0 }
  0x27   : > { %4430 = sst [smem:[#allocation35_spill]] %s4518_s12  ;;  %p3595_p7 = por %p72_p6, %p4367_p4 }
  0x28   : > { %p134_p8 = scmp.eq.s32.totalorder %s133_s15, 0  ;;  %s55_s10 = ssub.s32 %s3419_s26, %s4518_s12 }
  0x29   : > { %s4431_s11 = scalar_select %p3595_p7, 1, 0 }
  0x2a   : > { %p143_p9 = scmp.ne.s32.totalorder %s3391_s19, %s3387_s18  ;;  %p56_p10 = scmp.eq.s32.totalorder %s55_s10, 0 }
  0x2b   : > { %4432 = sst [smem:[#allocation36_spill]] %s4431_s11  ;;  %p149_p11 = scmp.ne.s32.totalorder %s3387_s18, %s3383_s17 }
  0x2c   : > { %s3606_s30 = scalar_select %p134_p8, %s3391_s19, %s136_s16  }
  0x2d   : > { %s3609_s2 = scalar_select %p56_p10, %s3403_s22, %s58_s13  }
  0x2e   : > { %4433 = sst [smem:[#allocation37_spill]] %s3606_s30  ;;  %p3613_p12 = por %p143_p9, %p66_p2 }
  0x2f   : > { %4434 = sst [smem:[#allocation38_spill]] %s3609_s2  ;;  %p3619_p13 = por %p149_p11, %p72_p6 }
  0x30   : > { %p355_p0 = scmp.eq.s32.totalorder %s3561_s28, 7  ;;  %p361_p5 = scmp.eq.s32.totalorder %s2489_s29, 7 }
  0x31   : > { %s4436_s15 = scalar_select %p3619_p13, 1, 0 }
  0x32   : > { %p2807_p4 = scmp.lt.s32.totalorder %s3423_s27, 8  ;;  %p3628_p7 = por %p355_p0, %p65_p1 }
  0x33   : > { %4437 = sst [smem:[#allocation39_spill]] %s4436_s15  ;;  %p4440_p8 = scmp.ne.s32.totalorder %s3399_s21, %s3395_s20 }
  0x34   : > { %s4438_s10 = scalar_select %p3628_p7, 1, 0 }
  0x35   : > { %p3635_p10 = por %p361_p5, %p4440_p8  ;;  %s4372_s13 = sand.u32 1, %s3403_s22  }
  0x36   : > { %4439 = sst [smem:[#allocation40_spill]] %s4438_s10  ;;  %s4378_s16 = sshll.u32 %s3419_s26, 7 }
  0x37   : > { %s4441_s17 = scalar_select %p3635_p10, 1, 0 }
  0x38   : > { %s3643_s12 = sshll.u32 %s4372_s13, 3  ;;  %p3647_p2 = pnand %p2807_p4, %p3578_p3 }
  0x39   : > { %4442 = sst [smem:[#allocation41_spill]] %s4441_s17  ;;  %s3652_s2 = sand.u32 1, %s3423_s27  }
  0x3a   : > { %s4443_s29 = scalar_select %p3647_p2, 1, 0 }
  0x3b   : > { %s4444_s1 = sld [smem:[#allocation45_spill]]  ;;  %s403_s14 = scalar_lea.vmem [#allocation6], %s3643_s12 }
  0x3c   : > { %s410_s13 = sshll.u32 %s403_s14, 4  ;;  %p3666_p1 = pnand %p2807_p4, %p3613_p12  ;;  %s3662_s13 = int_to_ptr.vmem [resolvable:$true] %s410_s13 }
  0x3d   : > { %s4382_s24 = scalar_lea.sflag [#allocation7], %s3652_s2  ;;  %p4386_p6 = pneg %p3647_p2 }
  0x3e   : > { %s4445_s10 = scalar_select %p3666_p1, 1, 0 }
  0x41   : > { %s3659_s17 = scalar_lea.hbm %s4444_s1, %s4378_s16  ;;  %s3016_s14 = scalar_lea.hbm %s4444_s1, 256 }
  0x42   : > { %s3011_s15 = scalar_lea.hbm %s3659_s17, 128  ;;  %p3017_p4 = scmp.lt.u32.totalorder %s3659_s17, %s4444_s1 }
  0x43   : > { %p3012_p3 = scmp.ne.s32.totalorder %s3659_s17, %s3011_s15  ;;  %p3018_p12 = scmp.lt.u32.totalorder %s3016_s14, %s3011_s15 }
  0x44   : > { %p3020_p5 = scmp.lt.u32.totalorder %s3011_s15, %s3659_s17 }
  0x45   : > { %p3014_p9 = pnand %p4386_p6, %p3012_p3  ;;  %p3019_p0 = por %p3018_p12, %p3017_p4 }
  0x47   : > { %p3015_p11 = pneg %p3014_p9  ;;  %p3021_p8 = por %p3020_p5, %p3019_p0 }
  0x49   : > { %p3022_p10 = pnand %p3021_p8, %p3015_p11 }
  0x4b   : > { %3025 = shalt.err (!%p3022_p10)
}
  0x4c   : > { %s3026_s23 = scalar_lea.vmem %s3662_s13, 128  ;;  %s3425_s20 = smov [#allocation6]  }
  0x4d   : > { %p3027_p3 = scmp.ne.s32.totalorder %s3662_s13, %s3026_s23  ;;  %s3031_s30 = sshll.u32 %s3425_s20, 4  ;;  %s3032_s30 = int_to_ptr.vmem [resolvable:$false] %s3031_s30 }
  0x4e   : > { %s3033_s18 = scalar_lea.vmem %s3032_s30, 256  ;;  %p3034_p13 = scmp.lt.s32.totalorder %s3662_s13, %s3032_s30 }
  0x4f   : > { %p3029_p9 = pnand %p3027_p3, %p4386_p6  ;;  %p3035_p4 = scmp.lt.s32.totalorder %s3033_s18, %s3026_s23 }
  0x51   : > { %p3030_p7 = pneg %p3029_p9  ;;  %p3036_p12 = por %p3035_p4, %p3034_p13 }
  0x53   : > { %p3037_p0 = pnand %p3036_p12, %p3030_p7 }
  0x55   : > { %3040 = shalt.err (!%p3037_p0)
}
  0x56   : > { %2781 = dma.hbm_to_vmem [thread:$0]  (!%p3647_p2), %s3659_s17, 128, %s3662_s13, %s4382_s24  }
  0x57   : > { %p2517_p10 = scmp.ge.s32.totalorder %s3423_s27, 1  ;;  %p571_p11 = scmp.lt.s32.totalorder %s3423_s27, 9 }
  0x58   : > { %s3701_s15 = sand.u32 1, %s3391_s19   ;;  %s4385_s23 = sshll.u32 %s3415_s25, 10 }
  0x59   : > { %s4384_s16 = sshll.u32 %s3701_s15, 6  ;;  %p3704_p7 = pnand %p2517_p10, %p571_p11 }
  0x5a   : > { %s448_s20 = scalar_lea.vmem [#allocation9], %s4384_s16  ;;  %s4448_s4 = sld [smem:[#allocation47_spill]] }
  0x5b   : > { %s4446_s14 = scalar_select %p3704_p7, 1, 0 }
  0x5c   : > { %s455_s30 = sshll.u32 %s448_s20, 4  ;;  %p3725_p5 = pneg %p3666_p1  ;;  %s3718_s30 = int_to_ptr.vmem [resolvable:$true] %s455_s30 }
  0x5d   : > { %4447 = sst [smem:[#allocation42_spill]] %s4446_s14 }
  0x5e   : > { %s4449_s19 = scalar_select %p3725_p5, 1, 0 }
  0x60   : > { %s3716_s17 = scalar_lea.hbm %s4448_s4, %s4385_s23  ;;  %s3046_s18 = scalar_lea.hbm %s4448_s4, 4096 }
  0x61   : > { %s3041_s24 = scalar_lea.hbm %s3716_s17, 1024  ;;  %p3047_p9 = scmp.lt.u32.totalorder %s3716_s17, %s4448_s4 }
  0x62   : > { %p3042_p13 = scmp.ne.s32.totalorder %s3716_s17, %s3041_s24  ;;  %p3048_p4 = scmp.lt.u32.totalorder %s3046_s18, %s3041_s24 }
  0x63   : > { %p3050_p0 = scmp.lt.u32.totalorder %s3041_s24, %s3716_s17 }
  0x64   : > { %p3044_p8 = pnand %p3725_p5, %p3042_p13  ;;  %p3049_p12 = por %p3048_p4, %p3047_p9 }
  0x66   : > { %p3045_p3 = pneg %p3044_p8  ;;  %p3051_p10 = por %p3050_p0, %p3049_p12 }
  0x68   : > { %p3052_p11 = pnand %p3051_p10, %p3045_p3 }
  0x6a   : > { %3055 = shalt.err (!%p3052_p11)
}
  0x6b   : > { %s3056_s13 = scalar_lea.vmem %s3718_s30, 1024  ;;  %s3426_s1 = smov [#allocation9]  }
  0x6c   : > { %p3057_p13 = scmp.ne.s32.totalorder %s3718_s30, %s3056_s13  ;;  %s3061_s20 = sshll.u32 %s3426_s1, 4  ;;  %s3062_s20 = int_to_ptr.vmem [resolvable:$false] %s3061_s20 }
  0x6d   : > { %s3063_s16 = scalar_lea.vmem %s3062_s20, 2048  ;;  %p3064_p7 = scmp.lt.s32.totalorder %s3718_s30, %s3062_s20 }
  0x6e   : > { %p3059_p8 = pnand %p3057_p13, %p3725_p5  ;;  %p3065_p2 = scmp.lt.s32.totalorder %s3063_s16, %s3056_s13 }
  0x70   : > { %p3060_p6 = pneg %p3059_p8  ;;  %p3066_p9 = por %p3065_p2, %p3064_p7 }
  0x72   : > { %p3067_p4 = pnand %p3066_p9, %p3060_p6 }
  0x74   : > { %3070 = shalt.err (!%p3067_p4)
}
  0x75   : > { %s4397_s24 = smov 64   ;;  %s4399_s23 = smov 4  }
  0x76   : > { %s4450_s13 = scalar_lea.sflag [#allocation10], %s3652_s2  ;;  %s4451_s18 = sshll.u32 %s3415_s25, 10 }
  0x77   : > { %2787 = dma.hbm_to_vmem [thread:$0]  (!%p3666_p1), %s3716_s17, 1024, %s3718_s30, %s4450_s13, %s4397_s24, %s4397_s24, %s4399_s23  }
  0x78   : > { %s3758_s16 = scalar_lea.hbm %s4357_s5, %s4451_s18  ;;  %s4452_s4 = sshll.u32 %s3701_s15, 6 }
  0x79   : > { %s469_s27 = scalar_lea.vmem [#allocation11], %s4452_s4  ;;  %s3763_s11 = sshll.u32 %s3701_s15, 7 }
  0x7a   : > { %s476_s28 = sshll.u32 %s469_s27, 4  ;;  %s3768_s21 = sshll.u32 %s3415_s25, 11  ;;  %s3765_s28 = int_to_ptr.vmem [resolvable:$true] %s476_s28 }
  0x7b   : > { %4453 = sst [smem:[#allocation43_spill]] %s3765_s28  ;;  %s4454_s6 = sld [smem:[#allocation48_spill]] }
  0x7c   : > { %s490_s17 = scalar_lea.vmem [#allocation12], %s3763_s11  ;;  %s4402_s27 = scalar_lea.sflag [#allocation13], %s3652_s2 }
  0x7d   : > { %s497_s4 = sshll.u32 %s490_s17, 4  ;;  %s3777_s4 = int_to_ptr.vmem [resolvable:$true] %s497_s4 }
  0x81   : > { %s3774_s30 = scalar_lea.hbm %s4454_s6, %s3768_s21  ;;  %s3076_s7 = scalar_lea.hbm %s4454_s6, 8192 }
  0x82   : > { %s3071_s13 = scalar_lea.hbm %s3774_s30, 2048  ;;  %p3077_p3 = scmp.lt.u32.totalorder %s3774_s30, %s4454_s6 }
  0x83   : > { %p3072_p2 = scmp.ne.s32.totalorder %s3774_s30, %s3071_s13  ;;  %p3078_p12 = scmp.lt.u32.totalorder %s3076_s7, %s3071_s13 }
  0x84   : > { %p3080_p10 = scmp.lt.u32.totalorder %s3071_s13, %s3774_s30 }
  0x85   : > { %p3074_p6 = pnand %p3072_p2, %p3725_p5  ;;  %p3079_p0 = por %p3078_p12, %p3077_p3 }
  0x87   : > { %p3075_p7 = pneg %p3074_p6  ;;  %p3081_p11 = por %p3080_p10, %p3079_p0 }
  0x89   : > { %p3082_p13 = pnand %p3081_p11, %p3075_p7 }
  0x8b   : > { %3085 = shalt.err (!%p3082_p13)
}
  0x8c   : > { %s3086_s17 = scalar_lea.vmem %s3777_s4, 2048  ;;  %s3429_s18 = smov [#allocation12]  }
  0x8d   : > { %p3087_p8 = scmp.ne.s32.totalorder %s3777_s4, %s3086_s17  ;;  %s3091_s1 = sshll.u32 %s3429_s18, 4  ;;  %s3092_s1 = int_to_ptr.vmem [resolvable:$false] %s3091_s1 }
  0x8e   : > { %s3093_s14 = scalar_lea.vmem %s3092_s1, 4096  ;;  %p3094_p2 = scmp.lt.s32.totalorder %s3777_s4, %s3092_s1 }
  0x8f   : > { %p3089_p9 = pnand %p3087_p8, %p3725_p5  ;;  %p3095_p6 = scmp.lt.s32.totalorder %s3093_s14, %s3086_s17 }
  0x91   : > { %p3090_p4 = pneg %p3089_p9  ;;  %p3096_p3 = por %p3095_p6, %p3094_p2 }
  0x93   : > { %p3097_p12 = pnand %p3096_p3, %p3090_p4 }
  0x95   : > { %3100 = shalt.err (!%p3097_p12)
}
  0x96   : > { %s4403_s13 = smov 128   ;;  %s4404_s7 = smov 8  }
  0x97   : > { %2793 = dma.hbm_to_vmem [thread:$0]  (!%p3666_p1), %s3774_s30, 2048, %s3777_s4, %s4402_s27, %s4403_s13, %s4403_s13, %s4404_s7  }
  0x98   : > { %s4405_s20 = sshll.u32 %s3701_s15, 1  ;;  %s2617_s17 = sshll.u32 %s3415_s25, 5 }
  0x99   : > { %s3811_s14 = scalar_lea.hbm %s4360_s8, %s2617_s17  ;;  %s532_s24 = scalar_lea.vmem [#allocation15], %s4405_s20 }
  0x9a   : > { %s540_s23 = sshll.u32 %s532_s24, 4  ;;  %s3820_s30 = scalar_lea.hbm %s4361_s9, %s2617_s17  ;;  %s3815_s23 = int_to_ptr.vmem [resolvable:$true] %s540_s23 }
  0x9b   : > { %s529_s4 = scalar_lea.sflag [#allocation16], %s3652_s2  ;;  %s3101_s27 = scalar_lea.hbm %s3811_s14, 32 }
  0x9c   : > { %p3102_p7 = scmp.ne.s32.totalorder %s3811_s14, %s3101_s27  ;;  %s3106_s13 = scalar_lea.hbm %s4360_s8, 128 }
  0x9d   : > { %p3107_p11 = scmp.lt.u32.totalorder %s3811_s14, %s4360_s8  ;;  %p3108_p13 = scmp.lt.u32.totalorder %s3106_s13, %s3101_s27 }
  0x9e   : > { %p3104_p0 = pnand %p3102_p7, %p3725_p5  ;;  %p3110_p9 = scmp.lt.u32.totalorder %s3101_s27, %s3811_s14 }
  0x9f   : > { %p3109_p8 = por %p3108_p13, %p3107_p11 }
  0xa0   : > { %p3105_p10 = pneg %p3104_p0 }
  0xa1   : > { %p3111_p4 = por %p3110_p9, %p3109_p8 }
  0xa3   : > { %p3112_p2 = pnand %p3111_p4, %p3105_p10 }
  0xa5   : > { %3115 = shalt.err (!%p3112_p2)
}
  0xa6   : > { %s3116_s6 = scalar_lea.vmem %s3815_s23, 32  ;;  %s3432_s28 = smov [#allocation15]  }
  0xa7   : > { %p3117_p6 = scmp.ne.s32.totalorder %s3815_s23, %s3116_s6  ;;  %s3121_s24 = sshll.u32 %s3432_s28, 4  ;;  %s3122_s24 = int_to_ptr.vmem [resolvable:$false] %s3121_s24 }
  0xa8   : > { %s3123_s7 = scalar_lea.vmem %s3122_s24, 64  ;;  %p3124_p7 = scmp.lt.s32.totalorder %s3815_s23, %s3122_s24 }
  0xa9   : > { %p3119_p3 = pnand %p3117_p6, %p3725_p5  ;;  %p3125_p0 = scmp.lt.s32.totalorder %s3123_s7, %s3116_s6 }
  0xab   : > { %p3120_p12 = pneg %p3119_p3  ;;  %p3126_p11 = por %p3125_p0, %p3124_p7 }
  0xad   : > { %p3127_p13 = pnand %p3126_p11, %p3120_p12 }
  0xaf   : > { %3130 = shalt.err (!%p3127_p13)
}
  0xb0   : > { %2799 = dma.hbm_to_vmem [thread:$0]  (!%p3666_p1), %s3811_s14, 32, %s3815_s23, %s529_s4  }
  0xb1   : > { %s4455_s27 = sshll.u32 %s3419_s26, 7  ;;  %s4456_s0 = sld [smem:[#allocation44_spill]] }
  0xb2   : > { %s385_s18 = scalar_lea.vmem [#allocation3], %s3643_s12  ;;  %s4457_s6 = sand.u32 1, %s3403_s22  }
  0xb3   : > { %s392_s1 = sshll.u32 %s385_s18, 4  ;;  %s382_s28 = scalar_lea.sflag [#allocation4], %s4457_s6  ;;  %s393_s1 = int_to_ptr.vmem [resolvable:$true] %s392_s1 }
  0xb4   : > { %p4458_p8 = scmp.ne.s32.totalorder %s4443_s29, 0 }
  0xb6   : > { %p4459_p9 = pneg %p4458_p8 }
  0xb7   : > { %s3851_s17 = scalar_lea.hbm %s4456_s0, %s4455_s27  ;;  %s3136_s7 = scalar_lea.hbm %s4456_s0, 256 }
  0xb8   : > { %s3131_s24 = scalar_lea.hbm %s3851_s17, 128  ;;  %p3137_p6 = scmp.lt.u32.totalorder %s3851_s17, %s4456_s0 }
  0xb9   : > { %p3132_p10 = scmp.ne.s32.totalorder %s3851_s17, %s3131_s24  ;;  %p3138_p3 = scmp.lt.u32.totalorder %s3136_s7, %s3131_s24 }
  0xba   : > { %p3140_p7 = scmp.lt.u32.totalorder %s3131_s24, %s3851_s17 }
  0xbb   : > { %p3134_p4 = pnand %p3132_p10, %p4459_p9  ;;  %p3139_p12 = por %p3138_p3, %p3137_p6 }
  0xbd   : > { %p3135_p2 = pneg %p3134_p4  ;;  %p3141_p0 = por %p3140_p7, %p3139_p12 }
  0xbf   : > { %p3142_p11 = pnand %p3141_p0, %p3135_p2 }
  0xc1   : > { %3145 = shalt.err (!%p3142_p11)
}
  0xc2   : > { %s3146_s12 = scalar_lea.vmem %s393_s1, 128  ;;  %p4460_p10 = pmov %p4459_p9 }
  0xc3   : > { %p3147_p13 = scmp.ne.s32.totalorder %s393_s1, %s3146_s12  ;;  %s3433_s20 = smov [#allocation3]  }
  0xc4   : > { %s3151_s18 = sshll.u32 %s3433_s20, 4  ;;  %s3152_s18 = int_to_ptr.vmem [resolvable:$false] %s3151_s18 }
  0xc5   : > { %p3149_p9 = pnand %p3147_p13, %p4460_p10  ;;  %s3153_s6 = scalar_lea.vmem %s3152_s18, 256 }
  0xc6   : > { %p3154_p1 = scmp.lt.s32.totalorder %s393_s1, %s3152_s18  ;;  %p3155_p5 = scmp.lt.s32.totalorder %s3153_s6, %s3146_s12 }
  0xc7   : > { %p3150_p4 = pneg %p3149_p9 }
  0xc8   : > { %p3156_p3 = por %p3155_p5, %p3154_p1 }
  0xca   : > { %p3157_p6 = pnand %p3156_p3, %p3150_p4 }
  0xcc   : > { %3160 = shalt.err (!%p3157_p6)
}
  0xcd   : > { %2778 = dma.hbm_to_vmem [thread:$0]  (!%p4458_p8), %s3851_s17, 128, %s393_s1, %s382_s28  }
  0xce   : > { %s3879_s14 = scalar_lea.hbm %s4355_s3, %s3768_s21  ;;  %s427_s7 = scalar_lea.vmem [#allocation8], %s3763_s11 }
  0xcf   : > { %s434_s27 = sshll.u32 %s427_s7, 4  ;;  %s3161_s13 = scalar_lea.hbm %s3879_s14, 2048  ;;  %s3882_s27 = int_to_ptr.vmem [resolvable:$true] %s434_s27 }
  0xd0   : > { %p3162_p1 = scmp.ne.s32.totalorder %s3879_s14, %s3161_s13  ;;  %p4461_p5 = scmp.ne.s32.totalorder %s4449_s19, 0 }
  0xd1   : > { %s3166_s1 = scalar_lea.hbm %s4355_s3, 8192  ;;  %p3167_p8 = scmp.lt.u32.totalorder %s3879_s14, %s4355_s3 }
  0xd2   : > { %p3164_p2 = pnand %p3162_p1, %p4461_p5  ;;  %p3168_p7 = scmp.lt.u32.totalorder %s3166_s1, %s3161_s13 }
  0xd3   : > { %p3170_p11 = scmp.lt.u32.totalorder %s3161_s13, %s3879_s14 }
  0xd4   : > { %p3165_p12 = pneg %p3164_p2  ;;  %p3169_p0 = por %p3168_p7, %p3167_p8 }
  0xd6   : > { %p3171_p13 = por %p3170_p11, %p3169_p0 }
  0xd8   : > { %p3172_p10 = pnand %p3171_p13, %p3165_p12 }
  0xda   : > { %3175 = shalt.err (!%p3172_p10)
}
  0xdb   : > { %s3176_s20 = scalar_lea.vmem %s3882_s27, 2048  ;;  %s3434_s18 = smov [#allocation8]  }
  0xdc   : > { %p3177_p9 = scmp.ne.s32.totalorder %s3882_s27, %s3176_s20  ;;  %s3181_s6 = sshll.u32 %s3434_s18, 4  ;;  %s3182_s6 = int_to_ptr.vmem [resolvable:$false] %s3181_s6 }
  0xdd   : > { %s3183_s24 = scalar_lea.vmem %s3182_s6, 4096  ;;  %p3184_p6 = scmp.lt.s32.totalorder %s3882_s27, %s3182_s6 }
  0xde   : > { %p3179_p4 = pnand %p3177_p9, %p4461_p5  ;;  %p3185_p1 = scmp.lt.s32.totalorder %s3183_s24, %s3176_s20 }
  0xe0   : > { %p3180_p3 = pneg %p3179_p4  ;;  %p3186_p2 = por %p3185_p1, %p3184_p6 }
  0xe2   : > { %p3187_p8 = pnand %p3186_p2, %p3180_p3 }
  0xe4   : > { %3190 = shalt.err (!%p3187_p8)
}
  0xe5   : > { %p4462_p12 = scmp.ne.s32.totalorder %s4445_s10, 0  ;;  %s4463_s23 = smov 8  }
  0xe6   : > { %s4464_s7 = smov 128   ;;  %s4465_s13 = scalar_lea.sflag [#allocation7], %s3652_s2 }
  0xe7   : > { %2784 = dma.hbm_to_vmem [thread:$0]  (!%p4462_p12), %s3879_s14, 2048, %s3882_s27, %s4465_s13, %s4464_s7, %s4464_s7, %s4463_s23  }
  0xe8   : > { %s3191_s29 = scalar_lea.hbm %s3758_s16, 1024  ;;  %s3196_s28 = scalar_lea.hbm %s4357_s5, 4096 }
  0xe9   : > { %p3192_p7 = scmp.ne.s32.totalorder %s3758_s16, %s3191_s29  ;;  %p3197_p13 = scmp.lt.u32.totalorder %s3758_s16, %s4357_s5 }
  0xea   : > { %p3198_p10 = scmp.lt.u32.totalorder %s3196_s28, %s3191_s29  ;;  %p3200_p4 = scmp.lt.u32.totalorder %s3191_s29, %s3758_s16 }
  0xeb   : > { %p3194_p0 = pnand %p3192_p7, %p4461_p5 }
  0xec   : > { %p3199_p9 = por %p3198_p10, %p3197_p13 }
  0xed   : > { %p3195_p11 = pneg %p3194_p0 }
  0xee   : > { %p3201_p3 = por %p3200_p4, %p3199_p9 }
  0xf0   : > { %p3202_p6 = pnand %p3201_p3, %p3195_p11 }
  0xf2   : > { %3205 = shalt.err (!%p3202_p6)
}
  0xf3   : > { %s4466_s14 = sld [smem:[#allocation43_spill]]  ;;  %s3435_s18 = smov [#allocation11]  }
  0xf4   : > { %s3211_s6 = sshll.u32 %s3435_s18, 4  ;;  %s3212_s6 = int_to_ptr.vmem [resolvable:$false] %s3211_s6 }
  0xf5   : > { %s3213_s24 = scalar_lea.vmem %s3212_s6, 2048 }
  0xf9   : > { %s3206_s27 = scalar_lea.vmem %s4466_s14, 1024  ;;  %p3214_p7 = scmp.lt.s32.totalorder %s4466_s14, %s3212_s6 }
  0xfa   : > { %p3207_p1 = scmp.ne.s32.totalorder %s4466_s14, %s3206_s27  ;;  %p3215_p0 = scmp.lt.s32.totalorder %s3213_s24, %s3206_s27 }
  0xfc   : > { %p3209_p2 = pnand %p3207_p1, %p4461_p5  ;;  %p3216_p13 = por %p3215_p0, %p3214_p7 }
  0xfe   : > { %p3210_p8 = pneg %p3209_p2 }
 0x100   : > { %p3217_p10 = pnand %p3216_p13, %p3210_p8 }
 0x102   : > { %3220 = shalt.err (!%p3217_p10)
}
 0x103   : > { %s4467_s23 = smov 4   ;;  %s4468_s7 = smov 64  }
 0x104   : > { %s4469_s13 = scalar_lea.sflag [#allocation10], %s3652_s2  ;;  %s4470_s1 = sld [smem:[#allocation49_spill]] }
 0x105   : > { %2790 = dma.hbm_to_vmem [thread:$0]  (!%p4462_p12), %s3758_s16, 1024, %s4466_s14, %s4469_s13, %s4468_s7, %s4468_s7, %s4467_s23  }
 0x106   : > { %s511_s12 = scalar_lea.vmem [#allocation14], %s3763_s11  ;;  %s4471_s27 = sshll.u32 %s3701_s15, 1 }
 0x107   : > { %s518_s20 = sshll.u32 %s511_s12, 4  ;;  %s3947_s18 = scalar_lea.vmem [#allocation17], %s4471_s27  ;;  %s3943_s20 = int_to_ptr.vmem [resolvable:$true] %s518_s20 }
 0x108   : > { %s559_s6 = sshll.u32 %s3947_s18, 4  ;;  %s560_s6 = int_to_ptr.vmem [resolvable:$true] %s559_s6 }
 0x10a   : > { %s3940_s28 = scalar_lea.hbm %s4470_s1, %s3768_s21  ;;  %s3226_s14 = scalar_lea.hbm %s4470_s1, 8192 }
 0x10b   : > { %s3221_s24 = scalar_lea.hbm %s3940_s28, 2048  ;;  %p3227_p3 = scmp.lt.u32.totalorder %s3940_s28, %s4470_s1 }
 0x10c   : > { %p3222_p11 = scmp.ne.s32.totalorder %s3940_s28, %s3221_s24  ;;  %p3228_p6 = scmp.lt.u32.totalorder %s3226_s14, %s3221_s24 }
 0x10d   : > { %p3230_p2 = scmp.lt.u32.totalorder %s3221_s24, %s3940_s28 }
 0x10e   : > { %p3224_p9 = pnand %p3222_p11, %p4461_p5  ;;  %p3229_p1 = por %p3228_p6, %p3227_p3 }
 0x110   : > { %p3225_p4 = pneg %p3224_p9  ;;  %p3231_p8 = por %p3230_p2, %p3229_p1 }
 0x112   : > { %p3232_p7 = pnand %p3231_p8, %p3225_p4 }
 0x114   : > { %3235 = shalt.err (!%p3232_p7)
}
 0x115   : > { %s3236_s11 = scalar_lea.vmem %s3943_s20, 2048  ;;  %s3436_s15 = smov [#allocation14]  }
 0x116   : > { %p3237_p0 = scmp.ne.s32.totalorder %s3943_s20, %s3236_s11  ;;  %s3241_s17 = sshll.u32 %s3436_s15, 4  ;;  %s3242_s17 = int_to_ptr.vmem [resolvable:$false] %s3241_s17 }
 0x117   : > { %s3243_s12 = scalar_lea.vmem %s3242_s17, 4096  ;;  %p3244_p11 = scmp.lt.s32.totalorder %s3943_s20, %s3242_s17 }
 0x118   : > { %p3239_p13 = pnand %p3237_p0, %p4461_p5  ;;  %p3245_p9 = scmp.lt.s32.totalorder %s3243_s12, %s3236_s11 }
 0x11a   : > { %p3240_p10 = pneg %p3239_p13  ;;  %p3246_p3 = por %p3245_p9, %p3244_p11 }
 0x11c   : > { %p3247_p6 = pnand %p3246_p3, %p3240_p10 }
 0x11e   : > { %3250 = shalt.err (!%p3247_p6)
}
 0x11f   : > { %s4472_s27 = scalar_lea.sflag [#allocation13], %s3652_s2  ;;  %s3251_s24 = scalar_lea.hbm %s3820_s30, 32 }
 0x120   : > { %2796 = dma.hbm_to_vmem [thread:$0]  (!%p4462_p12), %s3940_s28, 2048, %s3943_s20, %s4472_s27, %s4468_s7, %s4468_s7, %s4467_s23  }
 0x121   : > { %p3252_p4 = scmp.ne.s32.totalorder %s3820_s30, %s3251_s24  ;;  %s3256_s14 = scalar_lea.hbm %s4361_s9, 128 }
 0x122   : > { %p3257_p8 = scmp.lt.u32.totalorder %s3820_s30, %s4361_s9  ;;  %p3258_p7 = scmp.lt.u32.totalorder %s3256_s14, %s3251_s24 }
 0x123   : > { %p3254_p1 = pnand %p3252_p4, %p4461_p5  ;;  %p3260_p13 = scmp.lt.u32.totalorder %s3251_s24, %s3820_s30 }
 0x124   : > { %p3259_p0 = por %p3258_p7, %p3257_p8 }
 0x125   : > { %p3255_p2 = pneg %p3254_p1 }
 0x126   : > { %p3261_p10 = por %p3260_p13, %p3259_p0 }
 0x128   : > { %p3262_p11 = pnand %p3261_p10, %p3255_p2 }
 0x12a   : > { %3265 = shalt.err (!%p3262_p11)
}
 0x12b   : > { %s3266_s23 = scalar_lea.vmem %s560_s6, 32  ;;  %s3437_s7 = smov [#allocation17]  }
 0x12c   : > { %p3267_p9 = scmp.ne.s32.totalorder %s560_s6, %s3266_s23  ;;  %s3271_s28 = sshll.u32 %s3437_s7, 4  ;;  %s3272_s28 = int_to_ptr.vmem [resolvable:$false] %s3271_s28 }
 0x12d   : > { %s3273_s20 = scalar_lea.vmem %s3272_s28, 64  ;;  %p3274_p4 = scmp.lt.s32.totalorder %s560_s6, %s3272_s28 }
 0x12e   : > { %p3269_p3 = pnand %p3267_p9, %p4461_p5  ;;  %p3275_p1 = scmp.lt.s32.totalorder %s3273_s20, %s3266_s23 }
 0x130   : > { %p3270_p6 = pneg %p3269_p3  ;;  %p3276_p12 = por %p3275_p1, %p3274_p4 }
 0x132   : > { %p3277_p7 = pnand %p3276_p12, %p3270_p6 }
 0x134   : > { %3280 = shalt.err (!%p3277_p7)
}
 0x135   : > { %p4473_p8 = scmp.ne.s32.totalorder %s4445_s10, 0  ;;  %s4474_s18 = sld [smem:[#allocation42_spill]] }
 0x137   : > { %2802 = dma.hbm_to_vmem [thread:$0]  (!%p4473_p8), %s3820_s30, 32, %s560_s6, %s529_s4  }
 0x13b   : > { %p4475_p2 = scmp.ne.s32.totalorder %s4474_s18, 0 }
 0x13c   : > { %s4476_s19 = sld [smem:[#allocation29_spill]] (!%p4475_p2)  ;;  %s4477_s11 = sld [smem:[#allocation36_spill]] (!%p4475_p2) }
 0x13d   : > { %575 = sbr.rel (%p4475_p2) target bundleno = 4408 (0x1138), region = 64 }
 0x142   : > { %s4000_s15 = sand.u32 (!%p4475_p2), 1, %s4476_s19   ;;  %p4478_p5 = scmp.ne.s32.totalorder (!%p4475_p2), %s4477_s11, 0 }
 0x143   : > { %s4003_s17 = sshll.u32 (!%p4475_p2), %s4000_s15, 3  ;;  %s578_s12 = scalar_lea.sflag (!%p4475_p2), [#allocation4], %s4000_s15 }
 0x144   : > { %3354 = dma.done.wait (%p4478_p5), %s578_s12, 128  }
 0x145   : > { %3356 = vsyncadd (%p4478_p5), %s578_s12, 4294967168  ;;  %s4479_s2 = sld [smem:[#allocation33_spill]] }
 0x14b   : > { %s586_s10 = sand.u32 1, %s4479_s2  }
 0x14c   : > { %s587_s30 = scalar_lea.sflag [#allocation7], %s586_s10 }
 0x14d   : > { %3358 = dma.done.wait (%p4478_p5), %s587_s30, 128  }
 0x14e   : > { %3360 = vsyncadd (%p4478_p5), %s587_s30, 4294967168  ;;  %s4480_s6 = sld [smem:[#allocation26_spill]]  ;;  %s4481_s24 = sld [smem:[#allocation39_spill]] }
 0x154   : > { %s597_s21 = sand.u32 1, %s4480_s6   ;;  %p4482_p12 = scmp.ne.s32.totalorder %s4481_s24, 0 }
 0x155   : > { %s2520_s16 = sshll.u32 %s597_s21, 7 }
 0x156   : > { %s4018_s14 = scalar_lea.vmem [#allocation8], %s2520_s16 }
 0x157   : > { %3362 = dma.done.wait (%p4482_p12), %s587_s30, 2048  }
 0x158   : > { %3364 = vsyncadd (%p4482_p12), %s587_s30, 4294965248  ;;  %s2521_s13 = sshll.u32 %s597_s21, 6  ;;  %s605_s29 = scalar_lea.sflag [#allocation10], %s586_s10 }
 0x159   : > { %s4024_s23 = scalar_lea.vmem [#allocation9], %s2521_s13 }
 0x15a   : > { %3366 = dma.done.wait (%p4482_p12), %s605_s29, 2048  }
 0x15b   : > { %3368 = vsyncadd (%p4482_p12), %s605_s29, 4294965248  ;;  %s4030_s7 = scalar_lea.vmem [#allocation11], %s2521_s13  ;;  %s623_s28 = scalar_lea.sflag [#allocation13], %s586_s10 }
 0x15c   : > { %s4032_s20 = scalar_lea.vmem [#allocation12], %s2520_s16 }
 0x15d   : > { %3370 = dma.done.wait (%p4482_p12), %s623_s28, 4096  }
 0x15e   : > { %3372 = vsyncadd (%p4482_p12), %s623_s28, 4294963200  ;;  %s2525_s18 = sshll.u32 %s597_s21, 1  ;;  %s4038_s19 = scalar_lea.vmem [#allocation14], %s2520_s16 }
 0x15f   : > { %s641_s11 = scalar_lea.sflag [#allocation16], %s586_s10  ;;  %s4040_s12 = scalar_lea.vmem [#allocation15], %s2525_s18 }
 0x160   : > { %3374 = dma.done.wait (%p4482_p12), %s641_s11, 64  }
 0x161   : > { %3376 = vsyncadd (%p4482_p12), %s641_s11, 4294967232  ;;  %s4483_s2 = sld [smem:[#allocation31_spill]]  ;;  %s4484_s30 = sld [smem:[#allocation30_spill]] }
 0x162   : > { %s4485_s16 = sld [smem:[#allocation46_spill]]  ;;  %s4486_s24 = sld [smem:[#allocation50_spill]] }
 0x163   : > { %s4061_s27 = scalar_lea.vmem [#allocation17], %s2525_s18  ;;  %s738_s0 = scalar_lea.vmem [#allocation18], %s4003_s17 }
 0x167   : > { %p739_p0 = scmp.lt.s32.totalorder %s4483_s2, 1  ;;  %p742_p13 = scmp.lt.s32.totalorder %s4484_s30, 3 }
 0x168   : > { %p2529_p10 = scmp.ne.s32.totalorder %s4484_s30, 0 }
 0x169   : > { %s4520_s2 = smov (!%p739_p0, %s4483_s2), 1  ;;  %s4487_s1 = scalar_lea.vmem (!%p2529_p10), [#allocation3], %s4003_s17 }
 0x16a   : > { %s743_s6 = scalar_select %p742_p13, %s4484_s30, 3 }
 0x16b   : > { %s741_s13 = scalar_lea.vmem %s4485_s16, %s4520_s2  ;;  %750 = sbr.rel (%p2529_p10) target bundleno = 370 (0x172), region = 104  ;;  %v751_v0 = vld [vmem:[%s4487_s1] sm:$0xff] (!%p2529_p10) }
 0x16c   : > { %s2528_s29 = sshll.u32 %s743_s6, 3  ;;  %752 = vst [vmem:[#allocation2] sm:$0xff] (!%p2529_p10), %v751_v0 }
 0x16d   : > { %s4059_s11 = scalar_lea.vmem %s4486_s24, %s2528_s29 }
 0x172 PF: > { %v2907_v1 = vld [vmem:[%s4018_s14 + $0x4] ss:$8 sps:$4 sm:$0xff]   ;;  %v2909_v2 = vld [vmem:[%s4018_s14] ss:$8 sps:$4 sm:$0xff]   ;;  %v3438_v3 = vmov 0   ;;  %v3439_v4 = vmov 0.0   ;;  %v858_v32 = vlaneseq }
 0x173   : > { %980 = vmatprep.mubr.bf16.mxu0 %v3438_v3  ;;  %2675 = vmatprep.subr.bf16.mxu1 %v3439_v4  ;;  %v2910_v5 = vld [vmem:[%s4018_s14 + $0x14] ss:$8 sps:$4 sm:$0xff]   ;;  %vm3440_vm0 = vmmov 0   ;;  %v2912_v6 = vld [vmem:[%s4018_s14 + $0x10] ss:$8 sps:$4 sm:$0xff]   ;;  %v2931_v12 = vld [vmem:[%s4024_s23] sm:$0xff]  }
 0x174   : > { %948 = vmatprep.subr.bf16.mxu0 %v2907_v1  ;;  %2691 = vmatprep.mubr.msk.bf16.mxu1 %vm3440_vm0, %v3439_v4  ;;  %v2913_v7 = vld [vmem:[%s4018_s14 + $0x24] ss:$8 sps:$4 sm:$0xff]   ;;  %v2915_v8 = vld [vmem:[%s4018_s14 + $0x20] ss:$8 sps:$4 sm:$0xff]   ;;  %v2916_v9 = vld [vmem:[%s4018_s14 + $0x34] ss:$8 sps:$4 sm:$0xff]  }
 0x175   : > { %949 = vmatpush1.bf16.msra.mxu0 %v2909_v2  ;;  %v2918_v10 = vld [vmem:[%s4018_s14 + $0x30] ss:$8 sps:$4 sm:$0xff]   ;;  %v2919_v11 = vld [vmem:[%s4018_s14 + $0x44] ss:$8 sps:$4 sm:$0xff]   ;;  %2676 = vmatpush3.bf16.msra.mxu1 %v2931_v12  ;;  %v2921_v14 = vld [vmem:[%s4018_s14 + $0x40] ss:$8 sps:$4 sm:$0xff]  }
 0x176   : > { %950 = vmatprep.subr.bf16.mxu0 %v2910_v5  ;;  %v2932_v13 = vld [vmem:[%s4024_s23 + $0x8] sm:$0xff]   ;;  %2677 = vmatprep.subr.bf16.mxu1 %v3439_v4  ;;  %v2922_v15 = vld [vmem:[%s4018_s14 + $0x54] ss:$8 sps:$4 sm:$0xff]   ;;  %v2924_v17 = vld [vmem:[%s4018_s14 + $0x50] ss:$8 sps:$4 sm:$0xff]   ;;  %s4488_s1 = scalar_lea.vmem [#allocation6], %s4003_s17 }
 0x177   : > { %v2933_v16 = vld [vmem:[%s4024_s23 + $0x10] sm:$0xff]   ;;  %v2925_v18 = vld [vmem:[%s4018_s14 + $0x64] ss:$8 sps:$4 sm:$0xff]   ;;  %v2934_v19 = vld [vmem:[%s4024_s23 + $0x18] sm:$0xff]   ;;  %v4115_v33 = vshrl.u32 %v858_v32, 7  ;;  %vm1088_vm1 = vcmask 261120  }
 0x178   : > { %v2927_v20 = vld [vmem:[%s4018_s14 + $0x60] ss:$8 sps:$4 sm:$0xff]   ;;  %v4091_v21 = vld [vmem:[#allocation2] sm:$0xff]  ;;  %v2937_v29 = vld [vmem:[%s4024_s23 + $0x30] sm:$0xff]   ;;  %s3441_s4 = smov 96   ;;  %vm1165_vm2 = vcmask 64512  }
 0x179   : > { %951 = vmatpush1.bf16.msra.mxu0 %v2912_v6  ;;  %2678 = vmatpush3.bf16.msra.mxu1 %v2932_v13  ;;  %v754_v22 = vld [vmem:[%s4488_s1] sm:$0xff]  ;;  %v2935_v24 = vld [vmem:[%s4024_s23 + $0x20] sm:$0xff]   ;;  %v2936_v27 = vld [vmem:[%s4024_s23 + $0x28] sm:$0xff]   ;;  %v989_v31 = vpack.c.bf16 %v4091_v21, %v4091_v21  ;;  %v4118_v34 = vsub.s32 1, %v4115_v33  ;;  %v4122_v36 = vsub.s32 0, %v4115_v33  ;;  %s3443_s2 = smov 32  }
 0x17a   : > { %952 = vmatprep.subr.bf16.mxu0 %v2913_v7  ;;  %2679 = vmatprep.subr.bf16.mxu1 %v3439_v4  ;;  %v2928_v23 = vld [vmem:[%s4018_s14 + $0x74] ss:$8 sps:$4 sm:$0xff]   ;;  %v2930_v25 = vld [vmem:[%s4018_s14 + $0x70] ss:$8 sps:$4 sm:$0xff]   ;;  %v855_v26 = vadd.f32 %v754_v22, %v4091_v21  ;;  %v852_v35 = vld [vmem:[%s4040_s12] sm:$0x3] }
 0x17b   : > { %v2938_v30 = vld [vmem:[%s4024_s23 + $0x38] sm:$0xff]   ;;  %v865_v37 = vrot.slane %v852_v35, %v4118_v34  ;;  %v861_v39 = vrot.slane %v852_v35, %v4122_v36  ;;  %s3442_s12 = smov 64   ;;  %vm1759_vm3 = vcmask 523264   ;;  %vm1761_vm4 = vcmask 785408  }
 0x17c   : > { %v856_v28 = vpack.c.bf16 %v855_v26, %v855_v26  ;;  %v4135_v45 = vld [vmem:[%s4059_s11] sm:$0xff] }
 0x17d   : > { %953 = vmatpush1.bf16.msra.mxu0 %v2915_v8  ;;  %2680 = vmatpush3.bf16.msra.mxu1 %v2933_v16  ;;  %v993_v46 = vrot.slane %v4135_v45, %v4122_v36  ;;  %v4155_v52 = vld [vmem:[%s741_s13] ss:$0 sm:$0xff] }
 0x17e   : > { %954 = vmatprep.subr.bf16.mxu0 %v2916_v9  ;;  %2681 = vmatprep.subr.bf16.mxu1 %v3439_v4 }
 0x181   : > { %955 = vmatpush1.bf16.msra.mxu0 %v2918_v10  ;;  %2682 = vmatpush3.bf16.msra.mxu1 %v2934_v19 }
 0x182   : > { %956 = vmatprep.subr.bf16.mxu0 %v2919_v11  ;;  %2683 = vmatprep.subr.bf16.mxu1 %v3439_v4 }
 0x185   : > { %957 = vmatpush1.bf16.msra.mxu0 %v2921_v14  ;;  %2684 = vmatpush3.bf16.msra.mxu1 %v2935_v24 }
 0x186   : > { %958 = vmatprep.subr.bf16.mxu0 %v2922_v15  ;;  %2685 = vmatprep.subr.bf16.mxu1 %v3439_v4 }
 0x189   : > { %959 = vmatpush1.bf16.msra.mxu0 %v2924_v17  ;;  %2686 = vmatpush3.bf16.msra.mxu1 %v2936_v27 }
 0x18a   : > { %960 = vmatprep.subr.bf16.mxu0 %v2925_v18  ;;  %2687 = vmatprep.subr.bf16.mxu1 %v3439_v4 }
 0x18d   : > { %961 = vmatpush1.bf16.msra.mxu0 %v2927_v20  ;;  %2688 = vmatpush3.bf16.msra.mxu1 %v2937_v29 }
 0x18e   : > { %962 = vmatprep.subr.bf16.mxu0 %v2928_v23  ;;  %2689 = vmatprep.subr.bf16.mxu1 %v3439_v4 }
 0x191   : > { %963 = vmatpush1.bf16.msra.mxu0 %v2930_v25  ;;  %2690 = vmatpush3.bf16.msra.mxu1 %v2938_v30 }
 0x192   : > { %2735 = vmatprep.subr.bf16.mxu0 %v3439_v4  ;;  %2695 = vmatprep.subr.mxu1 %v3439_v4 }
 0x194   : > { %981 = vmatmul.mubr.bf16.vlgmr.msra.gmra.mrb[0].mxu0 %v856_v28  ;;  %2692 = vmatmul.mubr.bf16.vlgmr.msra.gmra.mrb[0].mxu1 %v989_v31 }
 0x195   : > { %2751 = vmatprep.mubr.msk.bf16.mxu0 %vm3440_vm0, %v3439_v4  ;;  %2697 = vmatprep.mubr.msk.f32.mxu1 %vm3440_vm0, %v3439_v4 }
 0x267   : > { %v982_v38 = vpop.f32.mrb[0].mxu0  ;;  %v1076_v47 = vpop.f32.mrb[0].mxu1 }
 0x268   : > { %v984_v40 = vpop.f32.mrb[1].mxu0  ;;  %v4132_v44 = vadd.f32 %v982_v38, %v861_v39  ;;  %v4146_v48 = vadd.f32 %v1076_v47, %v993_v46  ;;  %v2693_v49 = vpop.f32.mrb[1].mxu1 }
 0x269   : > { %v4126_v41 = vadd.f32 %v984_v40, %v865_v37  ;;  %v986_v42 = vpop.f32.mrb[2].mxu0  ;;  %v1079_v50 = vpop.f32.mrb[2].mxu1 }
 0x26a   : > { %v987_v43 = vpop.f32.mrb[3].mxu0  ;;  %v2694_v51 = vpop.f32.mrb[3].mxu1 }
 0x26b   : > { %1252 = vrot.lane.b32.xlu1 %v4126_v41, %s3441_s4  ;;  %2696 = vmatpush3.xpose.msk.msra.mxu1 %vm1088_vm1, %v4126_v41 }
 0x26c   : > { %2700 = vmatprep.subr.mxu1 %v3439_v4 }
 0x26e   : > { %2698 = vmatmul.mubr.msk.f32.vlgmr.msra.gmra.mrb[4].mxu1 %vm1088_vm1, %v4132_v44 }
 0x26f   : > { %1250 = vrot.lane.b32.xlu1 %v4132_v44, %s3441_s4  ;;  %2702 = vmatprep.mubr.msk.f32.mxu1 %vm3440_vm0, %v3439_v4 }
 0x270   : > { %2701 = vmatpush3.msra.mxu1 %v4146_v48 }
 0x271   : > { %2705 = vmatprep.subr.mxu1 %v3439_v4 }
 0x2dd   : > { %v1253_v0 = vpop.permute.xlu1 %1252 }
 0x2e1   : > { %v1251_v2 = vpop.permute.xlu1 %1250 }
 0x341   : > { %v1161_v53 = vpop.f32.mrb[4].mxu1 }
 0x342   : > { %v1162_v54 = vadd.f32 %v4155_v52, %v1161_v53  ;;  %v2699_v55 = vpop.f32.mrb[5].mxu1 }
 0x344   : > { %v1166_v56 = vsel %vm1165_vm2, %v1162_v54, -inf }
 0x345   : > { %1167 = vmax.xlane.f32.xlu0 %v1166_v56 }
 0x3d2   : > { %v1168_v57 = vpop.xlane.xlu0 %1167 }
 0x3d3   : > { %v1169_v58 = vsub.f32 %v1162_v54, %v1168_v57 }
 0x3d5   : > { %v1170_v59 = vmul.f32 1.442695, %v1169_v58 }
 0x3d7   : > { %2987 = vpow2.f32 %v1170_v59  ;;  %v2939_v59 = vld [vmem:[%s4030_s7] sm:$0xff]  }
 0x3d8   : > { %2736 = vmatpush3.bf16.msra.mxu0 %v2939_v59  ;;  %v2975_v59 = vld [vmem:[%s4038_s19 + $0x50] sm:$0xff]  }
 0x3d9   : > { %2737 = vmatprep.subr.bf16.mxu0 %v3439_v4 }
 0x3e1   : > { %v2988_v60 = vpop.eup %2987 }
 0x3e2   : > { %v1172_v61 = vsel %vm1165_vm2, %v2988_v60, 0.0 }
 0x3e3   : > { %1173 = vadd.xlane.f32.xlu0 %v1172_v61  ;;  %v2941_v61 = vld [vmem:[%s4030_s7 + $0x10] sm:$0xff]  }
 0x470   : > { %v1174_v62 = vpop.xlane.xlu0 %1173 }
 0x471   : > { %2989 = vrcp.f32 %v1174_v62  ;;  %v2942_v62 = vld [vmem:[%s4030_s7 + $0x18] sm:$0xff]  }
 0x47b   : > { %v2990_v63 = vpop.eup %2989 }
 0x47c   : > { %v1176_v1 = vmul.f32 %v2990_v63, %v2988_v60  ;;  %v2940_v60 = vld [vmem:[%s4030_s7 + $0x8] sm:$0xff]   ;;  %v2943_v63 = vld [vmem:[%s4030_s7 + $0x20] sm:$0xff]  }
 0x47d   : > { %2738 = vmatpush3.bf16.msra.mxu0 %v2940_v60  ;;  %v2976_v60 = vld [vmem:[%s4038_s19 + $0x10] sm:$0xff]  }
 0x47e   : > { %2703 = vmatmul.mubr.msk.f32.vlgmr.msra.gmra.mrb[6].mxu1 %vm1165_vm2, %v1176_v1  ;;  %2739 = vmatprep.subr.bf16.mxu0 %v3439_v4  ;;  %v2946_v1 = vld [vmem:[%s4030_s7 + $0x38] sm:$0xff]  }
 0x47f   : > { %2706 = vmatpush3.xpose.msk.msra.mxu1 %vm1088_vm1, %v1253_v0  ;;  %2707 = vmatprep.mubr.msk.f32.mxu1 %vm3440_vm0, %v3439_v4  ;;  %v2945_v0 = vld [vmem:[%s4030_s7 + $0x30] sm:$0xff]  }
 0x480   : > { %2710 = vmatprep.subr.mxu1 %v3439_v4 }
 0x481   : > { %2740 = vmatpush3.bf16.msra.mxu0 %v2941_v61  ;;  %v2977_v61 = vld [vmem:[%s4038_s19 + $0x58] sm:$0xff]  }
 0x482   : > { %2708 = vmatmul.mubr.msk.f32.vlgmr.msra.gmra.mrb[8].mxu1 %vm1088_vm1, %v1251_v2  ;;  %2741 = vmatprep.subr.bf16.mxu0 %v3439_v4 }
 0x483   : > { %2712 = vmatprep.mubr.msk.f32.mxu1 %vm3440_vm0, %v3439_v4 }
 0x485   : > { %2742 = vmatpush3.bf16.msra.mxu0 %v2942_v62  ;;  %v2978_v62 = vld [vmem:[%s4038_s19 + $0x18] sm:$0xff]  }
 0x486   : > { %2743 = vmatprep.subr.bf16.mxu0 %v3439_v4 }
 0x489   : > { %2744 = vmatpush3.bf16.msra.mxu0 %v2943_v63  ;;  %v2979_v63 = vld [vmem:[%s4038_s19 + $0x60] sm:$0xff]  }
 0x48a   : > { %2745 = vmatprep.subr.bf16.mxu0 %v3439_v4 }
 0x551   : > { %v4168_v5 = vpop.f32.mrb[6].mxu1 }
 0x552   : > { %v2704_v6 = vpop.f32.mrb[7].mxu1 }
 0x555   : > { %v1324_v7 = vpop.f32.mrb[8].mxu1 }
 0x556   : > { %v1325_v8 = vadd.f32 %v4155_v52, %v1324_v7  ;;  %v2709_v9 = vpop.f32.mrb[9].mxu1 }
 0x558   : > { %v1328_v10 = vsel %vm1165_vm2, %v1325_v8, -inf }
 0x559   : > { %1329 = vmax.xlane.f32.xlu0 %v1328_v10 }
 0x56f   : > { %1340 = vrot.lane.b32.xlu0 %v4146_v48, %s3441_s4 }
 0x573   : > { %1418 = vrot.lane.b32.xlu0 %v4126_v41, %s3442_s12 }
 0x577   : > { %1416 = vrot.lane.b32.xlu0 %v4132_v44, %s3442_s12 }
 0x5e6   : > { %v1330_v11 = vpop.xlane.xlu0 %1329 }
 0x5e7   : > { %v1331_v12 = vsub.f32 %v1325_v8, %v1330_v11 }
 0x5e9   : > { %v1332_v13 = vmul.f32 1.442695, %v1331_v12 }
 0x5ea   : > { %v1341_v14 = vpop.permute.xlu0 %1340 }
 0x5eb   : > { %2991 = vpow2.f32 %v1332_v13  ;;  %2711 = vmatpush3.msra.mxu1 %v1341_v14  ;;  %v1767_v13 = vrot.slane %v4135_v45, %v4118_v34 }
 0x5ec   : > { %2715 = vmatprep.subr.mxu1 %v3439_v4 }
 0x5ee   : > { %v1419_v19 = vpop.permute.xlu0 %1418 }
 0x5f2   : > { %v1417_v22 = vpop.permute.xlu0 %1416 }
 0x5f5   : > { %v2992_v15 = vpop.eup %2991 }
 0x5f6   : > { %v1334_v16 = vsel %vm1165_vm2, %v2992_v15, 0.0 }
 0x5f7   : > { %1335 = vadd.xlane.f32.xlu1 %v1334_v16 }
 0x608   : > { %1505 = vrot.lane.b32.xlu1 %v4146_v48, %s3442_s12 }
 0x60c   : > { %1583 = vrot.lane.b32.xlu1 %v4126_v41, %s3443_s2 }
 0x684   : > { %v1336_v17 = vpop.xlane.xlu1 %1335 }
 0x685   : > { %2993 = vrcp.f32 %v1336_v17 }
 0x688   : > { %v1506_v23 = vpop.permute.xlu1 %1505 }
 0x68c   : > { %v1584_v38 = vpop.permute.xlu1 %1583 }
 0x68f   : > { %v2994_v18 = vpop.eup %2993 }
 0x690   : > { %v1338_v20 = vmul.f32 %v2994_v18, %v2992_v15 }
 0x692   : > { %2713 = vmatmul.mubr.msk.f32.vlgmr.msra.gmra.mrb[10].mxu1 %vm1165_vm2, %v1338_v20  ;;  %v2949_v20 = vld [vmem:[%s4032_s20 + $0x4] ss:$8 sps:$4 sm:$0xff]  }
 0x693   : > { %2716 = vmatpush3.xpose.msk.msra.mxu1 %vm1088_vm1, %v1419_v19  ;;  %2717 = vmatprep.mubr.msk.f32.mxu1 %vm3440_vm0, %v3439_v4 }
 0x694   : > { %2720 = vmatprep.subr.mxu1 %v3439_v4 }
 0x696   : > { %2718 = vmatmul.mubr.msk.f32.vlgmr.msra.gmra.mrb[12].mxu1 %vm1088_vm1, %v1417_v22  ;;  %v2952_v22 = vld [vmem:[%s4032_s20 + $0x14] ss:$8 sps:$4 sm:$0xff]  }
 0x697   : > { %2721 = vmatpush3.msra.mxu1 %v1506_v23  ;;  %2722 = vmatprep.mubr.msk.f32.mxu1 %vm3440_vm0, %v3439_v4  ;;  %v2950_v23 = vld [vmem:[%s4032_s20 + $0x10] ss:$8 sps:$4 sm:$0xff]  }
 0x698   : > { %2725 = vmatprep.subr.mxu1 %v3439_v4 }
 0x765   : > { %v1412_v24 = vpop.f32.mrb[10].mxu1 }
 0x766   : > { %v2714_v25 = vpop.f32.mrb[11].mxu1 }
 0x767   : > { %v2953_v25 = vld [vmem:[%s4032_s20 + $0x20] ss:$8 sps:$4 sm:$0xff]  }
 0x769   : > { %v1490_v26 = vpop.f32.mrb[12].mxu1 }
 0x76a   : > { %v1491_v27 = vadd.f32 %v4155_v52, %v1490_v26  ;;  %v2719_v28 = vpop.f32.mrb[13].mxu1 }
 0x76c   : > { %v1494_v29 = vsel %vm1165_vm2, %v1491_v27, -inf }
 0x76d   : > { %1495 = vmax.xlane.f32.xlu0 %v1494_v29  ;;  %v2958_v29 = vld [vmem:[%s4032_s20 + $0x34] ss:$8 sps:$4 sm:$0xff]  }
 0x7fa   : > { %v1496_v30 = vpop.xlane.xlu0 %1495 }
 0x7fb   : > { %v1497_v31 = vsub.f32 %v1491_v27, %v1496_v30  ;;  %v2956_v30 = vld [vmem:[%s4032_s20 + $0x30] ss:$8 sps:$4 sm:$0xff]  }
 0x7fd   : > { %v1498_v32 = vmul.f32 1.442695, %v1497_v31  ;;  %v2961_v31 = vld [vmem:[%s4032_s20 + $0x44] ss:$8 sps:$4 sm:$0xff]  }
 0x7ff   : > { %2995 = vpow2.f32 %v1498_v32  ;;  %v2959_v32 = vld [vmem:[%s4032_s20 + $0x40] ss:$8 sps:$4 sm:$0xff]  }
 0x809   : > { %v2996_v35 = vpop.eup %2995 }
 0x80a   : > { %v1500_v37 = vsel %vm1165_vm2, %v2996_v35, 0.0 }
 0x80b   : > { %1501 = vadd.xlane.f32.xlu1 %v1500_v37  ;;  %v2962_v37 = vld [vmem:[%s4032_s20 + $0x50] ss:$8 sps:$4 sm:$0xff]  }
 0x81c   : > { %1581 = vrot.lane.b32.xlu1 %v4132_v44, %s3443_s2 }
 0x898   : > { %v1502_v39 = vpop.xlane.xlu1 %1501 }
 0x899   : > { %2997 = vrcp.f32 %v1502_v39  ;;  %v2965_v39 = vld [vmem:[%s4032_s20 + $0x60] ss:$8 sps:$4 sm:$0xff]  }
 0x89c   : > { %v1582_v42 = vpop.permute.xlu1 %1581 }
 0x8a3   : > { %v2998_v40 = vpop.eup %2997 }
 0x8a4   : > { %v1504_v41 = vmul.f32 %v2998_v40, %v2996_v35  ;;  %v2964_v35 = vld [vmem:[%s4032_s20 + $0x54] ss:$8 sps:$4 sm:$0xff]  }
 0x8a5   : > { %v2970_v40 = vld [vmem:[%s4032_s20 + $0x74] ss:$8 sps:$4 sm:$0xff]  }
 0x8a6   : > { %2723 = vmatmul.mubr.msk.f32.vlgmr.msra.gmra.mrb[14].mxu1 %vm1165_vm2, %v1504_v41  ;;  %v2968_v41 = vld [vmem:[%s4032_s20 + $0x70] ss:$8 sps:$4 sm:$0xff]  }
 0x8a7   : > { %2726 = vmatpush3.xpose.msk.msra.mxu1 %vm1088_vm1, %v1584_v38  ;;  %2727 = vmatprep.mubr.msk.f32.mxu1 %vm3440_vm0, %v3439_v4  ;;  %v2967_v38 = vld [vmem:[%s4032_s20 + $0x64] ss:$8 sps:$4 sm:$0xff]  }
 0x8a8   : > { %2730 = vmatprep.subr.mxu1 %v3439_v4 }
 0x8aa   : > { %2728 = vmatmul.mubr.msk.f32.vlgmr.msra.gmra.mrb[16].mxu1 %vm1088_vm1, %v1582_v42 }
 0x8ab   : > { %2732 = vmatprep.mubr.msk.f32.mxu1 %vm3440_vm0, %v3439_v4 }
 0x979   : > { %v1577_v43 = vpop.f32.mrb[14].mxu1 }
 0x97a   : > { %v2724_v44 = vpop.f32.mrb[15].mxu1 }
 0x97d   : > { %v1655_v46 = vpop.f32.mrb[16].mxu1 }
 0x97e   : > { %v1656_v47 = vadd.f32 %v4155_v52, %v1655_v46  ;;  %v2729_v49 = vpop.f32.mrb[17].mxu1  ;;  %v1871_v46 = vsub.s32 3, %v4115_v33 }
 0x980   : > { %v1659_v50 = vsel %vm1165_vm2, %v1656_v47, -inf  ;;  %v1872_v49 = vrot.slane %v4135_v45, %v1871_v46 }
 0x981   : > { %1660 = vmax.xlane.f32.xlu0 %v1659_v50 }
 0x997   : > { %1670 = vrot.lane.b32.xlu0 %v4146_v48, %s3443_s2 }
 0x99b   : > { %1747 = vrot.lane.b32.xlu0 %v1412_v24, %s3443_s2  ;;  %v2955_v24 = vld [vmem:[%s4032_s20 + $0x24] ss:$8 sps:$4 sm:$0xff]  }
 0x99f   : > { %1751 = vrot.lane.b32.xlu0 %v1577_v43, %s3442_s12 }
 0xa0e   : > { %v1661_v51 = vpop.xlane.xlu0 %1660 }
 0xa0f   : > { %v1662_v53 = vsub.f32 %v1656_v47, %v1661_v51  ;;  %v1876_v47 = vsub.s32 4, %v4115_v33 }
 0xa11   : > { %v1663_v54 = vmul.f32 1.442695, %v1662_v53  ;;  %v1877_v53 = vrot.slane %v4135_v45, %v1876_v47 }
 0xa12   : > { %v1671_v55 = vpop.permute.xlu0 %1670 }
 0xa13   : > { %2999 = vpow2.f32 %v1663_v54  ;;  %2731 = vmatpush3.msra.mxu1 %v1671_v55 }
 0xa14   : > { %1971 = vmatprep.subr.bf16.mxu1 %v2949_v20 }
 0xa16   : > { %v1748_v7 = vpop.permute.xlu0 %1747 }
 0xa17   : > { %v1758_v9 = vsel %vm1088_vm1, %v4168_v5, %v1748_v7  ;;  %v2947_v5 = vld [vmem:[%s4032_s20] ss:$8 sps:$4 sm:$0xff]   ;;  %v2985_v7 = vld [vmem:[%s4038_s19 + $0x78] sm:$0xff]  }
 0xa1a   : > { %v1752_v8 = vpop.permute.xlu0 %1751 }
 0xa1b   : > { %v1760_v10 = vsel %vm1759_vm3, %v1758_v9, %v1752_v8  ;;  %v2986_v8 = vld [vmem:[%s4038_s19 + $0x38] sm:$0xff]   ;;  %v853_v9 = vld [vmem:[%s4061_s27] sm:$0x3]  ;;  %s4490_s27 = sld [smem:[#allocation30_spill]] }
 0xa1d   : > { %v3000_v52 = vpop.eup %2999 }
 0xa1e   : > { %v1665_v56 = vsel %vm1165_vm2, %v3000_v52, 0.0 }
 0xa1f   : > { %1666 = vadd.xlane.f32.xlu1 %v1665_v56  ;;  %v2971_v56 = vld [vmem:[%s4038_s19 + $0x40] sm:$0xff]  }
 0xa21   : > { %p2607_p11 = scmp.ne.s32.totalorder %s4490_s27, 3 }
 0xaac   : > { %v1667_v57 = vpop.xlane.xlu1 %1666 }
 0xaad   : > { %3001 = vrcp.f32 %v1667_v57  ;;  %v2972_v57 = vld [vmem:[%s4038_s19] sm:$0xff]  }
 0xab7   : > { %v3002_v48 = vpop.eup %3001 }
 0xab8   : > { %v1669_v58 = vmul.f32 %v3002_v48, %v3000_v52  ;;  %v2973_v48 = vld [vmem:[%s4038_s19 + $0x48] sm:$0xff]  }
 0xaba   : > { %2733 = vmatmul.mubr.msk.f32.vlgmr.msra.gmra.mrb[18].mxu1 %vm1165_vm2, %v1669_v58  ;;  %v2974_v58 = vld [vmem:[%s4038_s19 + $0x8] sm:$0xff]  }
 0xabb   : > { %2003 = vmatprep.mubr.bf16.mxu1 %v3438_v3  ;;  %v2944_v3 = vld [vmem:[%s4030_s7 + $0x28] sm:$0xff]   ;;  %1972 = vmatpush1.bf16.msra.mxu1 %v2947_v5 }
 0xabc   : > { %2746 = vmatpush3.bf16.msra.mxu0 %v2944_v3  ;;  %1973 = vmatprep.subr.bf16.mxu1 %v2952_v22  ;;  %v2980_v3 = vld [vmem:[%s4038_s19 + $0x20] sm:$0xff]  }
 0xabd   : > { %2747 = vmatprep.subr.bf16.mxu0 %v3439_v4 }
 0xabf   : > { %1974 = vmatpush1.bf16.msra.mxu1 %v2950_v23 }
 0xac0   : > { %2748 = vmatpush3.bf16.msra.mxu0 %v2945_v0  ;;  %1975 = vmatprep.subr.bf16.mxu1 %v2955_v24  ;;  %v2981_v0 = vld [vmem:[%s4038_s19 + $0x68] sm:$0xff]  }
 0xac1   : > { %2749 = vmatprep.subr.bf16.mxu0 %v3439_v4 }
 0xac3   : > { %1976 = vmatpush1.bf16.msra.mxu1 %v2953_v25 }
 0xac4   : > { %2750 = vmatpush3.bf16.msra.mxu0 %v2946_v1  ;;  %1977 = vmatprep.subr.bf16.mxu1 %v2958_v29  ;;  %v2982_v1 = vld [vmem:[%s4038_s19 + $0x28] sm:$0xff]  }
 0xac5   : > { %2653 = vmatprep.subr.bf16.mxu0 %v2971_v56  ;;  %v2186_v56 = vsub.s32 5, %v4115_v33 }
 0xac7   : > { %1978 = vmatpush1.bf16.msra.mxu1 %v2956_v30 }
 0xac8   : > { %1979 = vmatprep.subr.bf16.mxu1 %v2961_v31 }
 0xacb   : > { %1980 = vmatpush1.bf16.msra.mxu1 %v2959_v32 }
 0xacc   : > { %1981 = vmatprep.subr.bf16.mxu1 %v2964_v35 }
 0xacf   : > { %1982 = vmatpush1.bf16.msra.mxu1 %v2962_v37  ;;  %v2034_v37 = vsub.s32 2, %v4115_v33 }
 0xad0   : > { %1983 = vmatprep.subr.bf16.mxu1 %v2967_v38 }
 0xad3   : > { %1984 = vmatpush1.bf16.msra.mxu1 %v2965_v39  ;;  %v2035_v39 = vrot.slane %v4135_v45, %v2034_v37 }
 0xad4   : > { %1985 = vmatprep.subr.bf16.mxu1 %v2970_v40 }
 0xad7   : > { %1986 = vmatpush1.bf16.msra.mxu1 %v2968_v41 }
 0xb8d   : > { %v1742_v2 = vpop.f32.mrb[18].mxu1 }
 0xb8e   : > { %1755 = vrot.lane.b32.xlu0 %v1742_v2, %s3441_s4  ;;  %v2734_v6 = vpop.f32.mrb[19].mxu1  ;;  %v2983_v2 = vld [vmem:[%s4038_s19 + $0x70] sm:$0xff]  }
 0xb8f   : > { %v2984_v6 = vld [vmem:[%s4038_s19 + $0x30] sm:$0xff]  }
 0xc00   : > { %v1756_v11 = vpop.permute.xlu0 %1755 }
 0xc01   : > { %v1762_v12 = vsel %vm1761_vm4, %v1760_v10, %v1756_v11  ;;  %v1884_v10 = vrot.slane %v853_v9, %v4122_v36  ;;  %v1888_v11 = vrot.slane %v853_v9, %v4118_v34 }
 0xc02   : > { %v1763_v4 = vpack.c.bf16 %v1762_v12, %v1762_v12 }
 0xc04   : > { %2752 = vmatmul.mubr.bf16.vlgmr.msra.gmra.mrb[4].mxu0 %v1763_v4 }
 0xc05   : > { %2654 = vmatpush3.bf16.msra.mxu0 %v2972_v57  ;;  %v2191_v57 = vsub.s32 6, %v4115_v33 }
 0xc06   : > { %2655 = vmatprep.subr.bf16.mxu0 %v2973_v48  ;;  %v2187_v48 = vrot.slane %v4135_v45, %v2186_v56 }
 0xc09   : > { %2656 = vmatpush3.bf16.msra.mxu0 %v2974_v58 }
 0xc0a   : > { %2657 = vmatprep.subr.bf16.mxu0 %v2975_v59  ;;  %v2192_v59 = vrot.slane %v4135_v45, %v2191_v57 }
 0xc0d   : > { %2658 = vmatpush3.bf16.msra.mxu0 %v2976_v60 }
 0xc0e   : > { %2659 = vmatprep.subr.bf16.mxu0 %v2977_v61 }
 0xc11   : > { %2660 = vmatpush3.bf16.msra.mxu0 %v2978_v62 }
 0xc12   : > { %2661 = vmatprep.subr.bf16.mxu0 %v2979_v63 }
 0xc15   : > { %2662 = vmatpush3.bf16.msra.mxu0 %v2980_v3 }
 0xc16   : > { %2663 = vmatprep.subr.bf16.mxu0 %v2981_v0 }
 0xc19   : > { %2664 = vmatpush3.bf16.msra.mxu0 %v2982_v1 }
 0xc1a   : > { %2665 = vmatprep.subr.bf16.mxu0 %v2983_v2 }
 0xc1d   : > { %2666 = vmatpush3.bf16.msra.mxu0 %v2984_v6 }
 0xc1e   : > { %2667 = vmatprep.subr.bf16.mxu0 %v2985_v7 }
 0xc21   : > { %2668 = vmatpush3.bf16.msra.mxu0 %v2986_v8 }
 0xcd7   : > { %v1850_v14 = vpop.f32.mrb[4].mxu0 }
 0xcd8   : > { %v1851_v15 = vadd.f32 %v1850_v14, %v1767_v13  ;;  %v2753_v16 = vpop.f32.mrb[5].mxu0 }
 0xcd9   : > { %v1853_v17 = vpop.f32.mrb[6].mxu0 }
 0xcda   : > { %v2754_v18 = vpop.f32.mrb[7].mxu0  ;;  %v1856_v19 = vadd.f32 %v1851_v15, %v4091_v21 }
 0xcdc   : > { %1857 = vadd.xlane.f32.xlu1 %v1856_v19 }
 0xd69   : > { %v1858_v21 = vpop.xlane.xlu1 %1857 }
 0xd6a   : > { %v1860_v26 = vmul.f32 0.0078125, %v1858_v21 }
 0xd6c   : > { %v1861_v27 = vsub.f32 %v1856_v19, %v1860_v26 }
 0xd6e   : > { %v1862_v28 = vmul.f32 %v1861_v27, %v1861_v27 }
 0xd70   : > { %1863 = vadd.xlane.f32.xlu0 %v1862_v28 }
 0xdfd   : > { %v1864_v42 = vpop.xlane.xlu0 %1863 }
 0xdfe   : > { %v1865_v43 = vmul.f32 0.0078125, %v1864_v42 }
 0xe00   : > { %v1866_v44 = vadd.f32 1e-05, %v1865_v43 }
 0xe02   : > { %3003 = vrsqrt.f32 %v1866_v44 }
 0xe0c   : > { %v3004_v50 = vpop.eup %3003 }
 0xe0d   : > { %v1868_v51 = vmul.f32 %v3004_v50, %v1861_v27 }
 0xe0f   : > { %v1873_v54 = vmul.f32 %v1872_v49, %v1868_v51 }
 0xe11   : > { %v4256_v55 = vadd.f32 %v1877_v53, %v1873_v54 }
 0xe13   : > { %v1879_v52 = vpack.c.bf16 %v4256_v55, %v4256_v55 }
 0xe15   : > { %2004 = vmatmul.mubr.bf16.vlgmr.msra.gmra.mrb[20].mxu1 %v1879_v52 }
 0xee8   : > { %v2005_v12 = vpop.f32.mrb[20].mxu1 }
 0xee9   : > { %v2006_v4 = vadd.f32 %v2005_v12, %v1884_v10  ;;  %v2007_v13 = vpop.f32.mrb[21].mxu1 }
 0xeea   : > { %v2008_v14 = vadd.f32 %v2007_v13, %v1888_v11  ;;  %v2009_v15 = vpop.f32.mrb[22].mxu1 }
 0xeeb   : > { %v2012_v16 = vmul.f32 %v2006_v4, %v2006_v4  ;;  %v2010_v17 = vpop.f32.mrb[23].mxu1 }
 0xeec   : > { %v2013_v18 = vmul.f32 %v2008_v14, %v2008_v14 }
 0xeed   : > { %v2014_v19 = vmul.f32 %v2012_v16, %v2006_v4 }
 0xeee   : > { %v2015_v5 = vmul.f32 %v2013_v18, %v2008_v14 }
 0xeef   : > { %v2016_v20 = vmul.f32 0.044715, %v2014_v19 }
 0xef0   : > { %v2017_v22 = vmul.f32 0.044715, %v2015_v5 }
 0xef1   : > { %v2018_v23 = vadd.f32 %v2016_v20, %v2006_v4 }
 0xef2   : > { %v2019_v24 = vadd.f32 %v2017_v22, %v2008_v14 }
 0xef3   : > { %v2020_v25 = vmul.f32 0.7978846, %v2018_v23 }
 0xef4   : > { %v2021_v21 = vmul.f32 0.7978846, %v2019_v24 }
 0xef5   : > { %3005 = vtanh.f32 %v2020_v25 }
 0xef6   : > { %3007 = vtanh.f32 %v2021_v21 }
 0xeff   : > { %v3006_v36 = vpop.eup %3005 }
 0xf00   : > { %v3008_v34 = vpop.eup %3007  ;;  %v2024_v26 = vadd.f32 1.0, %v3006_v36 }
 0xf01   : > { %v2025_v27 = vadd.f32 1.0, %v3008_v34 }
 0xf02   : > { %v2026_v28 = vmul.f32 0.5, %v2024_v26 }
 0xf03   : > { %v2027_v29 = vmul.f32 0.5, %v2025_v27 }
 0xf04   : > { %v2028_v30 = vmul.f32 %v2026_v28, %v2006_v4 }
 0xf05   : > { %v2029_v31 = vmul.f32 %v2027_v29, %v2008_v14 }
 0xf06   : > { %v2030_v35 = vpack.c.bf16 %v2028_v30, %v2028_v30 }
 0xf07   : > { %v2031_v32 = vpack.c.bf16 %v2029_v31, %v2029_v31 }
 0xf09   : > { %2164 = vmatprep.mubr.bf16.mxu0 %v2031_v32 }
 0xf0a   : > { %2165 = vmatmul.mubr.bf16.vlgmr.msra.gmra.mrb[8].mxu0 %v2030_v35 }
 0xfdd   : > { %v2669_v38 = vpop.f32.mrb[8].mxu0 }
 0xfde   : > { %v2670_v40 = vpop.f32.mrb[9].mxu0 }
 0xfdf   : > { %v2671_v41 = vadd.f32 %v2670_v40, %v2669_v38  ;;  %v2672_v42 = vpop.f32.mrb[10].mxu0 }
 0xfe0   : > { %v2673_v43 = vpop.f32.mrb[11].mxu0 }
 0xfe1   : > { %v2167_v44 = vadd.f32 %v2671_v41, %v2035_v39 }
 0xfe3   : > { %v2172_v46 = vadd.f32 %v2167_v44, %v4256_v55 }
 0xfe5   : > { %2173 = vadd.xlane.f32.xlu1 %v2172_v46 }
0x1072   : > { %v2174_v47 = vpop.xlane.xlu1 %2173 }
0x1073   : > { %v2175_v49 = vmul.f32 0.0078125, %v2174_v47 }
0x1075   : > { %v2176_v50 = vsub.f32 %v2172_v46, %v2175_v49 }
0x1077   : > { %v2177_v51 = vmul.f32 %v2176_v50, %v2176_v50 }
0x1079   : > { %2178 = vadd.xlane.f32.xlu1 %v2177_v51 }
0x1106   : > { %v2179_v53 = vpop.xlane.xlu1 %2178 }
0x1107   : > { %v2180_v54 = vmul.f32 0.0078125, %v2179_v53 }
0x1109   : > { %v2181_v52 = vadd.f32 1e-05, %v2180_v54 }
0x110b   : > { %3009 = vrsqrt.f32 %v2181_v52 }
0x1115   : > { %v3010_v58 = vpop.eup %3009 }
0x1116   : > { %v2183_v55 = vmul.f32 %v3010_v58, %v2176_v50  ;;  %2198 = sbr.rel (%p2607_p11) target bundleno = 4381 (0x111d), region = 108 }
0x1118   : > { %v2188_v60 = vmul.f32 %v2187_v48, %v2183_v55 }
0x111a   : > { %v2193_v61 = vadd.f32 %v2192_v59, %v2188_v60 }
0x111c   : > { %2194 = vst [vmem:[#allocation2] sm:$0xff] %v2193_v61  ;;  %2199 = vst [vmem:[%s738_s0] sm:$0xff] (!%p2607_p11), %v2193_v61 }
0x111d PF: > { %s4491_s7 = sld [smem:[#allocation31_spill]]  ;;  %s4492_s20 = sld [smem:[#allocation40_spill]] }
0x111e   : > { %s4493_s21 = sld [smem:[#allocation51_spill]]  ;;  %s2214_s13 = sshll.u32 %s738_s0, 4  ;;  %s2215_s13 = int_to_ptr.vmem [resolvable:$true] %s2214_s13 }
0x111f   : > { %s2201_s29 = scalar_lea.sflag [#allocation5], %s4000_s15  ;;  %s3281_s28 = scalar_lea.vmem %s2215_s13, 128 }
0x1120   : > { %p3282_p9 = scmp.ne.s32.totalorder %s2215_s13, %s3281_s28  ;;  %s3444_s24 = smov [#allocation18]  }
0x1121   : > { %s3285_s11 = sshll.u32 %s3444_s24, 4  ;;  %s3286_s11 = int_to_ptr.vmem [resolvable:$false] %s3285_s11 }
0x1122   : > { %s3287_s1 = scalar_lea.vmem %s3286_s11, 256  ;;  %p3288_p1 = scmp.lt.s32.totalorder %s2215_s13, %s3286_s11 }
0x1123   : > { %s2609_s19 = sshll.u32 %s4491_s7, 7  ;;  %p4495_p3 = scmp.ne.s32.totalorder %s4492_s20, 0 }
0x1124   : > { %s4494_s10 = smov %s4493_s21  ;;  %s4293_s16 = scalar_lea.hbm %s4493_s21, %s2609_s19 }
0x1125   : > { %p3283_p6 = pnand %p3282_p9, %p4495_p3  ;;  %p3289_p7 = scmp.lt.s32.totalorder %s3287_s1, %s3281_s28 }
0x1127   : > { %p3284_p4 = pneg %p3283_p6  ;;  %p3290_p8 = por %p3289_p7, %p3288_p1 }
0x1129   : > { %p3291_p2 = pnand %p3290_p8, %p3284_p4 }
0x112b   : > { %3294 = shalt.err (!%p3291_p2)
}
0x112c   : > { %s3295_s0 = scalar_lea.hbm %s4293_s16, 128  ;;  %s3299_s4 = scalar_lea.hbm %s4494_s10, 256 }
0x112d   : > { %p3296_p5 = scmp.ne.s32.totalorder %s4293_s16, %s3295_s0  ;;  %p3300_p13 = scmp.lt.u32.totalorder %s4293_s16, %s4494_s10 }
0x112e   : > { %p3301_p10 = scmp.lt.u32.totalorder %s3299_s4, %s3295_s0  ;;  %p3303_p9 = scmp.lt.u32.totalorder %s3295_s0, %s4293_s16 }
0x112f   : > { %p3297_p12 = pnand %p3296_p5, %p4495_p3 }
0x1130   : > { %p3302_p11 = por %p3301_p10, %p3300_p13 }
0x1131   : > { %p3298_p0 = pneg %p3297_p12 }
0x1132   : > { %p3304_p6 = por %p3303_p9, %p3302_p11 }
0x1134   : > { %p3305_p4 = pnand %p3304_p6, %p3298_p0 }
0x1136   : > { %3308 = shalt.err (!%p3305_p4)
}
0x1137   : > { %2773 = dma.vmem_to_hbm [thread:$0]  (%p4495_p3), %s2215_s13, 128, %s4293_s16, %s2201_s29  }
0x1138 PF: > { %s4496_s18 = sld [smem:[#allocation32_spill]]  ;;  %s4497_s12 = sld [smem:[#allocation28_spill]] }
0x1139   : > { %s4498_s2 = sld [smem:[#allocation41_spill]] }
0x113e   : > { %p2808_p1 = scmp.ge.s32.totalorder %s4496_s18, 2  ;;  %s2226_s27 = sand.u32 1, %s4497_s12  }
0x113f   : > { %p4499_p7 = scmp.ne.s32.totalorder %s4498_s2, 0  ;;  %s2227_s7 = scalar_lea.sflag [#allocation5], %s2226_s27 }
0x1141   : > { %p2804_p8 = pnand %p2808_p1, %p4499_p7 }
0x1143   : > { %3378 = dma.done.wait (!%p2804_p8), %s2227_s7, 128  }
0x1144   : > { %3380 = vsyncadd (!%p2804_p8), %s2227_s7, 4294967168  ;;  %s39_s27 = sadd.s32 1, %s4496_s18   ;;  %s4500_s17 = sld [smem:[#allocation26_spill]] }
0x1145   : > { %p36_p2 = scmp.ge.s32.totalorder %s39_s27, 10   ;;  %s4501_s18 = sld [smem:[#allocation27_spill]] }
0x1146   : > { %s4502_s19 = sld [smem:[#allocation37_spill]]  ;;  %s4503_s20 = sld [smem:[#allocation29_spill]] }
0x1147   : > { %s4504_s30 = sld [smem:[#allocation38_spill]]  ;;  %s4505_s6 = sld [smem:[#allocation34_spill]] }
0x1148   : > { %s4506_s16 = sld [smem:[#allocation35_spill]]  ;;  %s4507_s21 = smov %s3403_s22 }
0x1149   : > { %s4509_s23 = smov %s3415_s25  ;;  %s4510_s24 = smov %s3419_s26 }
0x114a   :  { %38 = sbr.rel (!%p36_p2) target bundleno = 26 (0x1a), region = 219 }
0x114d   : > { %s4508_s22 = smov %s4504_s30  ;;  %s4511_s25 = smov %s4505_s6 }
0x114e   : > { %s4512_s26 = smov %s4506_s16 }
0x1151   :  { %2232 = vsyncpa [#allocation4], 1 }
0x1152   :  { %2234 = vsyncpa [#allocation4 + $0x1], 1 }
0x1153   :  { %2235 = vsyncpa [#allocation7], 1 }
0x1154   :  { %2237 = vsyncpa [#allocation7 + $0x1], 1 }
0x1155   :  { %2238 = vsyncpa [#allocation10], 1 }
0x1156   :  { %2240 = vsyncpa [#allocation10 + $0x1], 1 }
0x1157   :  { %2241 = vsyncpa [#allocation13], 1 }
0x1158   :  { %2243 = vsyncpa [#allocation13 + $0x1], 1 }
0x1159   :  { %2244 = vsyncpa [#allocation16], 1 }
0x115a   :  { %2246 = vsyncpa [#allocation16 + $0x1], 1 }
0x115b   :  { %2247 = vsyncpa [#allocation5], 1 }
0x115c   :  { %2249 = vsyncpa [#allocation5 + $0x1], 1 }

</bundles_post_ra>
